<compile_context>
chip_gen: v7x
topology: tpu7x:2x2x1
jax: 0.10.0
libtpu: 0.0.40
codegen_flags: <defaults>
</compile_context>

<pallas_src>
import functools

import jax
import jax.numpy as jnp
from jax.experimental import pallas as pl
from jax.experimental.pallas import tpu as pltpu

LEAKY_SLOPE = 0.1   # kpnet_nonlinear_activation_params={'negative_slope': 0.1}
MAX_PAD = 2         # input conv: k=5 -> pad=2 ; residual/head convs: pad=1
LANE = 128


def _leaky_relu(x, slope=LEAKY_SLOPE):
    return jnp.where(x >= 0, x, slope * x)


# --------------------------------------------------------------------------
# Pallas kernel
# --------------------------------------------------------------------------
def _make_kernel(T, ccond, hidden):
    """Builds the fused KernelPredictor kernel body for static shapes."""

    def kernel(x_ref, w_in_ref, b_in_ref, w_res_ref, b_res_ref,
               w_head_ref, b_head_ref, out_ref, pad_ref):
        # pad_ref: (MAX_PAD + T + MAX_PAD, C_scr) f32 scratch.  Halo rows are
        # zeroed once per grid step; each layer writes its activations into the
        # interior rows, so implicit zero padding comes for free.
        c_scr = pad_ref.shape[1]
        zero_halo = jnp.zeros((MAX_PAD, c_scr), jnp.float32)
        pad_ref[:MAX_PAD, :] = zero_halo
        pad_ref[MAX_PAD + T:, :] = zero_halo

        def stage(act, cin):
            pad_ref[MAX_PAD:MAX_PAD + T, :cin] = act

        def conv(cin, ksize, padding, w2d, bias):
            # im2col: single (T, K*Cin) @ (K*Cin, Cout) MXU matmul with bf16
            # operands and f32 accumulation; bias added in f32.
            base = MAX_PAD - padding
            cols = [pad_ref[base + k:base + k + T, :cin] for k in range(ksize)]
            im = jnp.concatenate(cols, axis=1).astype(jnp.bfloat16)
            return jnp.dot(im, w2d, preferred_element_type=jnp.float32) + bias

        # input_conv: Conv1d(cond, hidden, k=5, pad=2) + LeakyReLU
        stage(x_ref[0], ccond)
        c = _leaky_relu(conv(ccond, 5, 2, w_in_ref[...], b_in_ref[...]))

        # 3 residual blocks: Dropout(p=0) -> Conv3 -> LReLU -> Conv3 -> LReLU
        for blk in range(3):
            stage(c, hidden)
            h = _leaky_relu(conv(hidden, 3, 1,
                                 w_res_ref[2 * blk], b_res_ref[2 * blk]))
            stage(h, hidden)
            h = _leaky_relu(conv(hidden, 3, 1,
                                 w_res_ref[2 * blk + 1], b_res_ref[2 * blk + 1]))
            c = c + h

        # Fused kernel/bias heads (k=3, pad=1), lane-padded output -> one
        # unmasked, lane-dense store.
        stage(c, hidden)
        out_ref[0] = conv(hidden, 3, 1, w_head_ref[...], b_head_ref[...])

    return kernel


# --------------------------------------------------------------------------
# Host-side wrapper
# --------------------------------------------------------------------------
def kernel_predictor_forward(c_in, kparams, *, conv_layers, conv_in_channels,
                             conv_out_channels, conv_kernel_size):
    """c_in: (batch, cond_channels, cond_length) — PyTorch NCL convention."""
    B, ccond, T = c_in.shape
    hidden = kparams["w_in"].shape[1]
    Ck = conv_in_channels * conv_out_channels * conv_kernel_size * conv_layers
    Cb = conv_out_channels * conv_layers
    C_pad = kparams["w_head"].shape[1]           # lane-padded fused head width
    C_scr = max(ccond, hidden)

    x_ntc = jnp.transpose(c_in, (0, 2, 1)).astype(jnp.float32)   # (B, T, Ccond)

    grid_spec = pltpu.PrefetchScalarGridSpec(
        num_scalar_prefetch=0,
        grid=(B,),
        in_specs=[
            pl.BlockSpec((1, T, ccond), lambda b: (b, 0, 0)),
            pl.BlockSpec((5 * ccond, hidden), lambda b: (0, 0)),
            pl.BlockSpec((1, hidden), lambda b: (0, 0)),
            pl.BlockSpec((6, 3 * hidden, hidden), lambda b: (0, 0, 0)),
            pl.BlockSpec((6, 1, hidden), lambda b: (0, 0, 0)),
            pl.BlockSpec((3 * hidden, C_pad), lambda b: (0, 0)),
            pl.BlockSpec((1, C_pad), lambda b: (0, 0)),
        ],
        out_specs=pl.BlockSpec((1, T, C_pad), lambda b: (b, 0, 0)),
        scratch_shapes=[pltpu.VMEM((T + 2 * MAX_PAD, C_scr), jnp.float32)],
    )

    # TODO(synk): for long cond_length (T in the thousands) add a T grid axis
    # with a 2*MAX_PAD halo and switch to time-on-lane layout.
    out = pl.pallas_call(
        _make_kernel(T, ccond, hidden),
        out_shape=jax.ShapeDtypeStruct((B, T, C_pad), jnp.float32),
        grid_spec=grid_spec,
        compiler_params=pltpu.CompilerParams(
            dimension_semantics=("parallel",),
            vmem_limit_bytes=32 * 1024 * 1024),
    )(x_ntc, kparams["w_in"], kparams["b_in"], kparams["w_res"],
      kparams["b_res"], kparams["w_head"], kparams["b_head"])

    # Split fused head, back to channel-major, then exact .view() semantics.
    k_nct = jnp.transpose(out[:, :, :Ck], (0, 2, 1))          # (B, Ck, T)
    b_nct = jnp.transpose(out[:, :, Ck:Ck + Cb], (0, 2, 1))   # (B, Cb, T)
    kernels = k_nct.reshape(B, conv_layers, conv_in_channels,
                            conv_out_channels, conv_kernel_size, T)
    bias = b_nct.reshape(B, conv_layers, conv_out_channels, T)
    return kernels, bias


# --------------------------------------------------------------------------
# Parameter construction (weight-norm folded, math layout) + kernel packing
# --------------------------------------------------------------------------
def _weight_norm_conv_params(key, cin, cout, ksize):
    """Synthetic weight-norm Conv1d params; returns (w:(K,Cin,Cout), b:(Cout,))."""
    kv, kg, kb = jax.random.split(key, 3)
    v = 0.1 * jax.random.normal(kv, (cout, cin, ksize), jnp.float32)  # torch layout
    g = 1.0 + 0.1 * jax.random.normal(kg, (cout,), jnp.float32)
    b = 0.1 * jax.random.normal(kb, (cout,), jnp.float32)
    norm = jnp.sqrt(jnp.sum(v * v, axis=(1, 2), keepdims=True))
    w = v * (g[:, None, None] / norm)                                  # fold weight-norm
    return jnp.transpose(w, (2, 1, 0)), b                              # (K, Cin, Cout)


def make_raw_params(key, cond_channels, conv_in_channels, conv_out_channels,
                    conv_layers, conv_kernel_size=3, hidden=64, kpnet_conv_size=3):
    kpnet_kernel_channels = (conv_in_channels * conv_out_channels *
                             conv_kernel_size * conv_layers)
    kpnet_bias_channels = conv_out_channels * conv_layers
    keys = jax.random.split(key, 9)

    w_in, b_in = _weight_norm_conv_params(keys[0], cond_channels, hidden, 5)
    res_w, res_b = [], []
    for i in range(6):  # 3 blocks x 2 convs
        w, b = _weight_norm_conv_params(keys[1 + i], hidden, hidden, kpnet_conv_size)
        res_w.append(w)
        res_b.append(b)
    w_k, b_k = _weight_norm_conv_params(keys[7], hidden, kpnet_kernel_channels,
                                        kpnet_conv_size)
    w_b, b_b = _weight_norm_conv_params(keys[8], hidden, kpnet_bias_channels,
                                        kpnet_conv_size)
    return {
        "w_in": w_in, "b_in": b_in,
        "w_res": jnp.stack(res_w, axis=0),   # (6, 3, H, H)
        "b_res": jnp.stack(res_b, axis=0),   # (6, H)
        "w_k": w_k, "b_k": b_k,
        "w_b": w_b, "b_b": b_b,
    }


def prep_kernel_params(raw):
    """Pack math-layout f32 params into the layout the Pallas kernel expects."""
    K_in, ccond, H = raw["w_in"].shape
    Ck = raw["w_k"].shape[2]
    Cb = raw["w_b"].shape[2]
    c_head = Ck + Cb
    c_pad = max(LANE, ((c_head + LANE - 1) // LANE) * LANE)

    w_in = raw["w_in"].reshape(K_in * ccond, H).astype(jnp.bfloat16)
    b_in = raw["b_in"].reshape(1, H).astype(jnp.float32)
    w_res = raw["w_res"].reshape(6, 3 * H, H).astype(jnp.bfloat16)
    b_res = raw["b_res"].reshape(6, 1, H).astype(jnp.float32)

    w_head = jnp.concatenate([raw["w_k"].reshape(3 * H, Ck),
                              raw["w_b"].reshape(3 * H, Cb)], axis=1)
    w_head = jnp.pad(w_head, ((0, 0), (0, c_pad - c_head))).astype(jnp.bfloat16)
    b_head = jnp.concatenate([raw["b_k"], raw["b_b"]])
    b_head = jnp.pad(b_head, (0, c_pad - c_head)).reshape(1, c_pad)
    b_head = b_head.astype(jnp.float32)

    return {"w_in": w_in, "b_in": b_in, "w_res": w_res, "b_res": b_res,
            "w_head": w_head, "b_head": b_head}


# --------------------------------------------------------------------------
# Pure-JAX f32 reference (for validation only)
# --------------------------------------------------------------------------
def kernel_predictor_reference(c_in, raw, *, conv_layers, conv_in_channels,
                               conv_out_channels, conv_kernel_size):
    B, _, T = c_in.shape
    x = jnp.transpose(c_in, (0, 2, 1)).astype(jnp.float32)    # (B, T, Ccond)

    def conv(xb, w, b, pad):
        K = w.shape[0]
        xp = jnp.pad(xb, ((0, 0), (pad, pad), (0, 0)))
        acc = jnp.zeros((B, T, w.shape[2]), jnp.float32)
        for k in range(K):
            acc = acc + jnp.einsum("btc,co->bto", xp[:, k:k + T, :], w[k])
        return acc + b[None, None, :]

    c = _leaky_relu(conv(x, raw["w_in"], raw["b_in"], 2))
    for i in range(3):
        h = _leaky_relu(conv(c, raw["w_res"][2 * i], raw["b_res"][2 * i], 1))
        h = _leaky_relu(conv(h, raw["w_res"][2 * i + 1], raw["b_res"][2 * i + 1], 1))
        c = c + h
    k = conv(c, raw["w_k"], raw["b_k"], 1)
    bz = conv(c, raw["w_b"], raw["b_b"], 1)
    k_nct = jnp.transpose(k, (0, 2, 1))
    b_nct = jnp.transpose(bz, (0, 2, 1))
    kernels = k_nct.reshape(B, conv_layers, conv_in_channels,
                            conv_out_channels, conv_kernel_size, T)
    bias = b_nct.reshape(B, conv_layers, conv_out_channels, T)
    return kernels, bias


# --------------------------------------------------------------------------
if __name__ == "__main__":
    # Small, forward-consistent configuration.
    B = 2
    cond_channels = 8
    conv_in_channels = 4
    conv_out_channels = 4
    conv_layers = 3
    conv_kernel_size = 3
    hidden = 64
    cond_length = 16

    root = jax.random.PRNGKey(0)
    k_params, k_input = jax.random.split(root)

    raw = make_raw_params(k_params, cond_channels, conv_in_channels,
                          conv_out_channels, conv_layers,
                          conv_kernel_size=conv_kernel_size, hidden=hidden)
    kparams = prep_kernel_params(raw)

    c = jax.random.normal(k_input, (B, cond_channels, cond_length), jnp.float32)

    fwd = functools.partial(kernel_predictor_forward,
                            conv_layers=conv_layers,
                            conv_in_channels=conv_in_channels,
                            conv_out_channels=conv_out_channels,
                            conv_kernel_size=conv_kernel_size)

    kernels, bias = fwd(c, kparams)
    jax.block_until_ready((kernels, bias))

    assert kernels.shape == (B, conv_layers, conv_in_channels,
                             conv_out_channels, conv_kernel_size, cond_length)
    assert bias.shape == (B, conv_layers, conv_out_channels, cond_length)

    # Validate against the f32 reference (bf16 MXU operands -> loose tolerance).
    kernels_ref, bias_ref = kernel_predictor_reference(
        c, raw, conv_layers=conv_layers, conv_in_channels=conv_in_channels,
        conv_out_channels=conv_out_channels, conv_kernel_size=conv_kernel_size)
    scale = max(1.0, float(jnp.max(jnp.abs(kernels_ref))),
                float(jnp.max(jnp.abs(bias_ref))))
    err = max(float(jnp.max(jnp.abs(kernels - kernels_ref))),
              float(jnp.max(jnp.abs(bias - bias_ref))))
    assert err <= 5e-2 * scale, f"mismatch vs reference: max abs err {err}"

    print("KERNEL_OK")
</pallas_src>

<mosaic_0001>
module attributes {stable_mosaic.version = 11 : i64} {
  func.func @kernel(%arg0: i32, %arg1: memref<1x16x8xf32, #tpu.memory_space<vmem>>, %arg2: memref<40x64xbf16, #tpu.memory_space<vmem>>, %arg3: memref<1x64xf32, #tpu.memory_space<vmem>>, %arg4: memref<6x192x64xbf16, #tpu.memory_space<vmem>>, %arg5: memref<6x1x64xf32, #tpu.memory_space<vmem>>, %arg6: memref<192x256xbf16, #tpu.memory_space<vmem>>, %arg7: memref<1x256xf32, #tpu.memory_space<vmem>>, %arg8: memref<1x16x256xf32, #tpu.memory_space<vmem>>, %arg9: memref<20x64xf32, #tpu.memory_space<vmem>>) attributes {dimension_semantics = [#tpu.dimension_semantics<parallel>], iteration_bounds = array<i64: 2>, scalar_prefetch = 0 : i64, scratch_operands = 1 : i64, tpu.core_type = #tpu.core_type<tc>, window_params = [{transform_indices = @transform_0, window_bounds = array<i64: 1, 16, 8>}, {pipeline_mode = #tpu.pipeline_mode<synchronous>, transform_indices = @transform_1, window_bounds = array<i64: 40, 64>}, {pipeline_mode = #tpu.pipeline_mode<synchronous>, transform_indices = @transform_2, window_bounds = array<i64: 1, 64>}, {pipeline_mode = #tpu.pipeline_mode<synchronous>, transform_indices = @transform_3, window_bounds = array<i64: 6, 192, 64>}, {pipeline_mode = #tpu.pipeline_mode<synchronous>, transform_indices = @transform_4, window_bounds = array<i64: 6, 1, 64>}, {pipeline_mode = #tpu.pipeline_mode<synchronous>, transform_indices = @transform_5, window_bounds = array<i64: 192, 256>}, {pipeline_mode = #tpu.pipeline_mode<synchronous>, transform_indices = @transform_6, window_bounds = array<i64: 1, 256>}, {transform_indices = @transform_7, window_bounds = array<i64: 1, 16, 256>}]} {
    %cst = arith.constant 0.000000e+00 : f32
    %0 = vector.broadcast %cst : f32 to vector<2x64xf32>
    %c0 = arith.constant 0 : index
    %c0_0 = arith.constant 0 : index
    %1 = vector.load %arg9[%c0, %c0_0] : memref<20x64xf32, #tpu.memory_space<vmem>>, vector<2x64xf32>
    tpu.vector_store %arg9[%c0, %c0_0], %0 {strides = array<i32>} : memref<20x64xf32, #tpu.memory_space<vmem>>, vector<2x64xf32>,
    %c18 = arith.constant 18 : index
    %c0_1 = arith.constant 0 : index
    %2 = vector.load %arg9[%c18, %c0_1] : memref<20x64xf32, #tpu.memory_space<vmem>>, vector<2x64xf32>
    tpu.vector_store %arg9[%c18, %c0_1], %0 {strides = array<i32>} : memref<20x64xf32, #tpu.memory_space<vmem>>, vector<2x64xf32>,
    %c0_2 = arith.constant 0 : index
    %c0_3 = arith.constant 0 : index
    %c0_4 = arith.constant 0 : index
    %3 = vector.load %arg1[%c0_2, %c0_3, %c0_4] : memref<1x16x8xf32, #tpu.memory_space<vmem>>, vector<1x16x8xf32>
    %4 = vector.shape_cast %3 : vector<1x16x8xf32> to vector<16x8xf32>
    %c2 = arith.constant 2 : index
    %c0_5 = arith.constant 0 : index
    %5 = vector.load %arg9[%c2, %c0_5] : memref<20x64xf32, #tpu.memory_space<vmem>>, vector<16x8xf32>
    tpu.vector_store %arg9[%c2, %c0_5], %4 {strides = array<i32>} : memref<20x64xf32, #tpu.memory_space<vmem>>, vector<16x8xf32>,
    %c0_6 = arith.constant 0 : index
    %c0_7 = arith.constant 0 : index
    %6 = vector.load %arg2[%c0_6, %c0_7] : memref<40x64xbf16, #tpu.memory_space<vmem>>, vector<40x64xbf16>
    %c0_8 = arith.constant 0 : index
    %c0_9 = arith.constant 0 : index
    %7 = vector.load %arg3[%c0_8, %c0_9] : memref<1x64xf32, #tpu.memory_space<vmem>>, vector<1x64xf32>
    %c0_10 = arith.constant 0 : index
    %c0_11 = arith.constant 0 : index
    %8 = vector.load %arg9[%c0_10, %c0_11] : memref<20x64xf32, #tpu.memory_space<vmem>>, vector<16x8xf32>
    %c1 = arith.constant 1 : index
    %c0_12 = arith.constant 0 : index
    %9 = vector.load %arg9[%c1, %c0_12] : memref<20x64xf32, #tpu.memory_space<vmem>>, vector<16x8xf32>
    %c2_13 = arith.constant 2 : index
    %c0_14 = arith.constant 0 : index
    %10 = vector.load %arg9[%c2_13, %c0_14] : memref<20x64xf32, #tpu.memory_space<vmem>>, vector<16x8xf32>
    %c3 = arith.constant 3 : index
    %c0_15 = arith.constant 0 : index
    %11 = vector.load %arg9[%c3, %c0_15] : memref<20x64xf32, #tpu.memory_space<vmem>>, vector<16x8xf32>
    %c4 = arith.constant 4 : index
    %c0_16 = arith.constant 0 : index
    %12 = vector.load %arg9[%c4, %c0_16] : memref<20x64xf32, #tpu.memory_space<vmem>>, vector<16x8xf32>
    %13 = tpu.concatenate %8, %9, %10, %11, %12 in 1 : vector<16x8xf32>, vector<16x8xf32>, vector<16x8xf32>, vector<16x8xf32>, vector<16x8xf32> -> vector<16x40xf32>
    %14 = arith.truncf %13 : vector<16x40xf32> to vector<16x40xbf16>
    %cst_17 = arith.constant dense<0.000000e+00> : vector<16x64xf32>
    %15 = tpu.matmul %14, %6, %cst_17 {dimension_numbers = #tpu.dot_dimension_numbers<[1], [0], [0], [1], [0, 0, 1, 1], [], []>} : vector<16x40xbf16>, vector<40x64xbf16>, vector<16x64xf32> -> vector<16x64xf32>
    %16 = vector.broadcast %7 : vector<1x64xf32> to vector<16x64xf32>
    %17 = arith.addf %15, %16 : vector<16x64xf32>
    %cst_18 = arith.constant 0.000000e+00 : f32
    %18 = vector.broadcast %cst_18 : f32 to vector<16x64xf32>
    %19 = arith.cmpf oge, %17, %18 : vector<16x64xf32>
    %cst_19 = arith.constant 1.000000e-01 : f32
    %20 = vector.broadcast %cst_19 : f32 to vector<16x64xf32>
    %21 = arith.mulf %20, %17 : vector<16x64xf32>
    %22 = arith.select %19, %17, %21 : vector<16x64xi1>, vector<16x64xf32>
    %c2_20 = arith.constant 2 : index
    %c0_21 = arith.constant 0 : index
    %23 = vector.load %arg9[%c2_20, %c0_21] : memref<20x64xf32, #tpu.memory_space<vmem>>, vector<16x64xf32>
    tpu.vector_store %arg9[%c2_20, %c0_21], %22 {strides = array<i32>} : memref<20x64xf32, #tpu.memory_space<vmem>>, vector<16x64xf32>,
    %c0_22 = arith.constant 0 : index
    %c0_23 = arith.constant 0 : index
    %c0_24 = arith.constant 0 : index
    %24 = vector.load %arg4[%c0_22, %c0_23, %c0_24] : memref<6x192x64xbf16, #tpu.memory_space<vmem>>, vector<1x192x64xbf16>
    %25 = vector.shape_cast %24 : vector<1x192x64xbf16> to vector<192x64xbf16>
    %c0_25 = arith.constant 0 : index
    %c0_26 = arith.constant 0 : index
    %c0_27 = arith.constant 0 : index
    %26 = vector.load %arg5[%c0_25, %c0_26, %c0_27] : memref<6x1x64xf32, #tpu.memory_space<vmem>>, vector<1x1x64xf32>
    %27 = vector.shape_cast %26 : vector<1x1x64xf32> to vector<1x64xf32>
    %c1_28 = arith.constant 1 : index
    %c0_29 = arith.constant 0 : index
    %28 = vector.load %arg9[%c1_28, %c0_29] : memref<20x64xf32, #tpu.memory_space<vmem>>, vector<16x64xf32>
    %c2_30 = arith.constant 2 : index
    %c0_31 = arith.constant 0 : index
    %29 = vector.load %arg9[%c2_30, %c0_31] : memref<20x64xf32, #tpu.memory_space<vmem>>, vector<16x64xf32>
    %c3_32 = arith.constant 3 : index
    %c0_33 = arith.constant 0 : index
    %30 = vector.load %arg9[%c3_32, %c0_33] : memref<20x64xf32, #tpu.memory_space<vmem>>, vector<16x64xf32>
    %31 = tpu.concatenate %28, %29, %30 in 1 : vector<16x64xf32>, vector<16x64xf32>, vector<16x64xf32> -> vector<16x192xf32>
    %32 = arith.truncf %31 : vector<16x192xf32> to vector<16x192xbf16>
    %cst_34 = arith.constant dense<0.000000e+00> : vector<16x64xf32>
    %33 = tpu.matmul %32, %25, %cst_34 {dimension_numbers = #tpu.dot_dimension_numbers<[1], [0], [0], [1], [0, 0, 1, 1], [], []>} : vector<16x192xbf16>, vector<192x64xbf16>, vector<16x64xf32> -> vector<16x64xf32>
    %34 = vector.broadcast %27 : vector<1x64xf32> to vector<16x64xf32>
    %35 = arith.addf %33, %34 : vector<16x64xf32>
    %cst_35 = arith.constant 0.000000e+00 : f32
    %36 = vector.broadcast %cst_35 : f32 to vector<16x64xf32>
    %37 = arith.cmpf oge, %35, %36 : vector<16x64xf32>
    %cst_36 = arith.constant 1.000000e-01 : f32
    %38 = vector.broadcast %cst_36 : f32 to vector<16x64xf32>
    %39 = arith.mulf %38, %35 : vector<16x64xf32>
    %40 = arith.select %37, %35, %39 : vector<16x64xi1>, vector<16x64xf32>
    %c2_37 = arith.constant 2 : index
    %c0_38 = arith.constant 0 : index
    %41 = vector.load %arg9[%c2_37, %c0_38] : memref<20x64xf32, #tpu.memory_space<vmem>>, vector<16x64xf32>
    tpu.vector_store %arg9[%c2_37, %c0_38], %40 {strides = array<i32>} : memref<20x64xf32, #tpu.memory_space<vmem>>, vector<16x64xf32>,
    %c1_39 = arith.constant 1 : index
    %c0_40 = arith.constant 0 : index
    %c0_41 = arith.constant 0 : index
    %42 = vector.load %arg4[%c1_39, %c0_40, %c0_41] : memref<6x192x64xbf16, #tpu.memory_space<vmem>>, vector<1x192x64xbf16>
    %43 = vector.shape_cast %42 : vector<1x192x64xbf16> to vector<192x64xbf16>
    %c1_42 = arith.constant 1 : index
    %c0_43 = arith.constant 0 : index
    %c0_44 = arith.constant 0 : index
    %44 = vector.load %arg5[%c1_42, %c0_43, %c0_44] : memref<6x1x64xf32, #tpu.memory_space<vmem>>, vector<1x1x64xf32>
    %45 = vector.shape_cast %44 : vector<1x1x64xf32> to vector<1x64xf32>
    %c1_45 = arith.constant 1 : index
    %c0_46 = arith.constant 0 : index
    %46 = vector.load %arg9[%c1_45, %c0_46] : memref<20x64xf32, #tpu.memory_space<vmem>>, vector<16x64xf32>
    %c2_47 = arith.constant 2 : index
    %c0_48 = arith.constant 0 : index
    %47 = vector.load %arg9[%c2_47, %c0_48] : memref<20x64xf32, #tpu.memory_space<vmem>>, vector<16x64xf32>
    %c3_49 = arith.constant 3 : index
    %c0_50 = arith.constant 0 : index
    %48 = vector.load %arg9[%c3_49, %c0_50] : memref<20x64xf32, #tpu.memory_space<vmem>>, vector<16x64xf32>
    %49 = tpu.concatenate %46, %47, %48 in 1 : vector<16x64xf32>, vector<16x64xf32>, vector<16x64xf32> -> vector<16x192xf32>
    %50 = arith.truncf %49 : vector<16x192xf32> to vector<16x192xbf16>
    %cst_51 = arith.constant dense<0.000000e+00> : vector<16x64xf32>
    %51 = tpu.matmul %50, %43, %cst_51 {dimension_numbers = #tpu.dot_dimension_numbers<[1], [0], [0], [1], [0, 0, 1, 1], [], []>} : vector<16x192xbf16>, vector<192x64xbf16>, vector<16x64xf32> -> vector<16x64xf32>
    %52 = vector.broadcast %45 : vector<1x64xf32> to vector<16x64xf32>
    %53 = arith.addf %51, %52 : vector<16x64xf32>
    %cst_52 = arith.constant 0.000000e+00 : f32
    %54 = vector.broadcast %cst_52 : f32 to vector<16x64xf32>
    %55 = arith.cmpf oge, %53, %54 : vector<16x64xf32>
    %cst_53 = arith.constant 1.000000e-01 : f32
    %56 = vector.broadcast %cst_53 : f32 to vector<16x64xf32>
    %57 = arith.mulf %56, %53 : vector<16x64xf32>
    %58 = arith.select %55, %53, %57 : vector<16x64xi1>, vector<16x64xf32>
    %59 = arith.addf %22, %58 : vector<16x64xf32>
    %c2_54 = arith.constant 2 : index
    %c0_55 = arith.constant 0 : index
    %60 = vector.load %arg9[%c2_54, %c0_55] : memref<20x64xf32, #tpu.memory_space<vmem>>, vector<16x64xf32>
    tpu.vector_store %arg9[%c2_54, %c0_55], %59 {strides = array<i32>} : memref<20x64xf32, #tpu.memory_space<vmem>>, vector<16x64xf32>,
    %c2_56 = arith.constant 2 : index
    %c0_57 = arith.constant 0 : index
    %c0_58 = arith.constant 0 : index
    %61 = vector.load %arg4[%c2_56, %c0_57, %c0_58] : memref<6x192x64xbf16, #tpu.memory_space<vmem>>, vector<1x192x64xbf16>
    %62 = vector.shape_cast %61 : vector<1x192x64xbf16> to vector<192x64xbf16>
    %c2_59 = arith.constant 2 : index
    %c0_60 = arith.constant 0 : index
    %c0_61 = arith.constant 0 : index
    %63 = vector.load %arg5[%c2_59, %c0_60, %c0_61] : memref<6x1x64xf32, #tpu.memory_space<vmem>>, vector<1x1x64xf32>
    %64 = vector.shape_cast %63 : vector<1x1x64xf32> to vector<1x64xf32>
    %c1_62 = arith.constant 1 : index
    %c0_63 = arith.constant 0 : index
    %65 = vector.load %arg9[%c1_62, %c0_63] : memref<20x64xf32, #tpu.memory_space<vmem>>, vector<16x64xf32>
    %c2_64 = arith.constant 2 : index
    %c0_65 = arith.constant 0 : index
    %66 = vector.load %arg9[%c2_64, %c0_65] : memref<20x64xf32, #tpu.memory_space<vmem>>, vector<16x64xf32>
    %c3_66 = arith.constant 3 : index
    %c0_67 = arith.constant 0 : index
    %67 = vector.load %arg9[%c3_66, %c0_67] : memref<20x64xf32, #tpu.memory_space<vmem>>, vector<16x64xf32>
    %68 = tpu.concatenate %65, %66, %67 in 1 : vector<16x64xf32>, vector<16x64xf32>, vector<16x64xf32> -> vector<16x192xf32>
    %69 = arith.truncf %68 : vector<16x192xf32> to vector<16x192xbf16>
    %cst_68 = arith.constant dense<0.000000e+00> : vector<16x64xf32>
    %70 = tpu.matmul %69, %62, %cst_68 {dimension_numbers = #tpu.dot_dimension_numbers<[1], [0], [0], [1], [0, 0, 1, 1], [], []>} : vector<16x192xbf16>, vector<192x64xbf16>, vector<16x64xf32> -> vector<16x64xf32>
    %71 = vector.broadcast %64 : vector<1x64xf32> to vector<16x64xf32>
    %72 = arith.addf %70, %71 : vector<16x64xf32>
    %cst_69 = arith.constant 0.000000e+00 : f32
    %73 = vector.broadcast %cst_69 : f32 to vector<16x64xf32>
    %74 = arith.cmpf oge, %72, %73 : vector<16x64xf32>
    %cst_70 = arith.constant 1.000000e-01 : f32
    %75 = vector.broadcast %cst_70 : f32 to vector<16x64xf32>
    %76 = arith.mulf %75, %72 : vector<16x64xf32>
    %77 = arith.select %74, %72, %76 : vector<16x64xi1>, vector<16x64xf32>
    %c2_71 = arith.constant 2 : index
    %c0_72 = arith.constant 0 : index
    %78 = vector.load %arg9[%c2_71, %c0_72] : memref<20x64xf32, #tpu.memory_space<vmem>>, vector<16x64xf32>
    tpu.vector_store %arg9[%c2_71, %c0_72], %77 {strides = array<i32>} : memref<20x64xf32, #tpu.memory_space<vmem>>, vector<16x64xf32>,
    %c3_73 = arith.constant 3 : index
    %c0_74 = arith.constant 0 : index
    %c0_75 = arith.constant 0 : index
    %79 = vector.load %arg4[%c3_73, %c0_74, %c0_75] : memref<6x192x64xbf16, #tpu.memory_space<vmem>>, vector<1x192x64xbf16>
    %80 = vector.shape_cast %79 : vector<1x192x64xbf16> to vector<192x64xbf16>
    %c3_76 = arith.constant 3 : index
    %c0_77 = arith.constant 0 : index
    %c0_78 = arith.constant 0 : index
    %81 = vector.load %arg5[%c3_76, %c0_77, %c0_78] : memref<6x1x64xf32, #tpu.memory_space<vmem>>, vector<1x1x64xf32>
    %82 = vector.shape_cast %81 : vector<1x1x64xf32> to vector<1x64xf32>
    %c1_79 = arith.constant 1 : index
    %c0_80 = arith.constant 0 : index
    %83 = vector.load %arg9[%c1_79, %c0_80] : memref<20x64xf32, #tpu.memory_space<vmem>>, vector<16x64xf32>
    %c2_81 = arith.constant 2 : index
    %c0_82 = arith.constant 0 : index
    %84 = vector.load %arg9[%c2_81, %c0_82] : memref<20x64xf32, #tpu.memory_space<vmem>>, vector<16x64xf32>
    %c3_83 = arith.constant 3 : index
    %c0_84 = arith.constant 0 : index
    %85 = vector.load %arg9[%c3_83, %c0_84] : memref<20x64xf32, #tpu.memory_space<vmem>>, vector<16x64xf32>
    %86 = tpu.concatenate %83, %84, %85 in 1 : vector<16x64xf32>, vector<16x64xf32>, vector<16x64xf32> -> vector<16x192xf32>
    %87 = arith.truncf %86 : vector<16x192xf32> to vector<16x192xbf16>
    %cst_85 = arith.constant dense<0.000000e+00> : vector<16x64xf32>
    %88 = tpu.matmul %87, %80, %cst_85 {dimension_numbers = #tpu.dot_dimension_numbers<[1], [0], [0], [1], [0, 0, 1, 1], [], []>} : vector<16x192xbf16>, vector<192x64xbf16>, vector<16x64xf32> -> vector<16x64xf32>
    %89 = vector.broadcast %82 : vector<1x64xf32> to vector<16x64xf32>
    %90 = arith.addf %88, %89 : vector<16x64xf32>
    %cst_86 = arith.constant 0.000000e+00 : f32
    %91 = vector.broadcast %cst_86 : f32 to vector<16x64xf32>
    %92 = arith.cmpf oge, %90, %91 : vector<16x64xf32>
    %cst_87 = arith.constant 1.000000e-01 : f32
    %93 = vector.broadcast %cst_87 : f32 to vector<16x64xf32>
    %94 = arith.mulf %93, %90 : vector<16x64xf32>
    %95 = arith.select %92, %90, %94 : vector<16x64xi1>, vector<16x64xf32>
    %96 = arith.addf %59, %95 : vector<16x64xf32>
    %c2_88 = arith.constant 2 : index
    %c0_89 = arith.constant 0 : index
    %97 = vector.load %arg9[%c2_88, %c0_89] : memref<20x64xf32, #tpu.memory_space<vmem>>, vector<16x64xf32>
    tpu.vector_store %arg9[%c2_88, %c0_89], %96 {strides = array<i32>} : memref<20x64xf32, #tpu.memory_space<vmem>>, vector<16x64xf32>,
    %c4_90 = arith.constant 4 : index
    %c0_91 = arith.constant 0 : index
    %c0_92 = arith.constant 0 : index
    %98 = vector.load %arg4[%c4_90, %c0_91, %c0_92] : memref<6x192x64xbf16, #tpu.memory_space<vmem>>, vector<1x192x64xbf16>
    %99 = vector.shape_cast %98 : vector<1x192x64xbf16> to vector<192x64xbf16>
    %c4_93 = arith.constant 4 : index
    %c0_94 = arith.constant 0 : index
    %c0_95 = arith.constant 0 : index
    %100 = vector.load %arg5[%c4_93, %c0_94, %c0_95] : memref<6x1x64xf32, #tpu.memory_space<vmem>>, vector<1x1x64xf32>
    %101 = vector.shape_cast %100 : vector<1x1x64xf32> to vector<1x64xf32>
    %c1_96 = arith.constant 1 : index
    %c0_97 = arith.constant 0 : index
    %102 = vector.load %arg9[%c1_96, %c0_97] : memref<20x64xf32, #tpu.memory_space<vmem>>, vector<16x64xf32>
    %c2_98 = arith.constant 2 : index
    %c0_99 = arith.constant 0 : index
    %103 = vector.load %arg9[%c2_98, %c0_99] : memref<20x64xf32, #tpu.memory_space<vmem>>, vector<16x64xf32>
    %c3_100 = arith.constant 3 : index
    %c0_101 = arith.constant 0 : index
    %104 = vector.load %arg9[%c3_100, %c0_101] : memref<20x64xf32, #tpu.memory_space<vmem>>, vector<16x64xf32>
    %105 = tpu.concatenate %102, %103, %104 in 1 : vector<16x64xf32>, vector<16x64xf32>, vector<16x64xf32> -> vector<16x192xf32>
    %106 = arith.truncf %105 : vector<16x192xf32> to vector<16x192xbf16>
    %cst_102 = arith.constant dense<0.000000e+00> : vector<16x64xf32>
    %107 = tpu.matmul %106, %99, %cst_102 {dimension_numbers = #tpu.dot_dimension_numbers<[1], [0], [0], [1], [0, 0, 1, 1], [], []>} : vector<16x192xbf16>, vector<192x64xbf16>, vector<16x64xf32> -> vector<16x64xf32>
    %108 = vector.broadcast %101 : vector<1x64xf32> to vector<16x64xf32>
    %109 = arith.addf %107, %108 : vector<16x64xf32>
    %cst_103 = arith.constant 0.000000e+00 : f32
    %110 = vector.broadcast %cst_103 : f32 to vector<16x64xf32>
    %111 = arith.cmpf oge, %109, %110 : vector<16x64xf32>
    %cst_104 = arith.constant 1.000000e-01 : f32
    %112 = vector.broadcast %cst_104 : f32 to vector<16x64xf32>
    %113 = arith.mulf %112, %109 : vector<16x64xf32>
    %114 = arith.select %111, %109, %113 : vector<16x64xi1>, vector<16x64xf32>
    %c2_105 = arith.constant 2 : index
    %c0_106 = arith.constant 0 : index
    %115 = vector.load %arg9[%c2_105, %c0_106] : memref<20x64xf32, #tpu.memory_space<vmem>>, vector<16x64xf32>
    tpu.vector_store %arg9[%c2_105, %c0_106], %114 {strides = array<i32>} : memref<20x64xf32, #tpu.memory_space<vmem>>, vector<16x64xf32>,
    %c5 = arith.constant 5 : index
    %c0_107 = arith.constant 0 : index
    %c0_108 = arith.constant 0 : index
    %116 = vector.load %arg4[%c5, %c0_107, %c0_108] : memref<6x192x64xbf16, #tpu.memory_space<vmem>>, vector<1x192x64xbf16>
    %117 = vector.shape_cast %116 : vector<1x192x64xbf16> to vector<192x64xbf16>
    %c5_109 = arith.constant 5 : index
    %c0_110 = arith.constant 0 : index
    %c0_111 = arith.constant 0 : index
    %118 = vector.load %arg5[%c5_109, %c0_110, %c0_111] : memref<6x1x64xf32, #tpu.memory_space<vmem>>, vector<1x1x64xf32>
    %119 = vector.shape_cast %118 : vector<1x1x64xf32> to vector<1x64xf32>
    %c1_112 = arith.constant 1 : index
    %c0_113 = arith.constant 0 : index
    %120 = vector.load %arg9[%c1_112, %c0_113] : memref<20x64xf32, #tpu.memory_space<vmem>>, vector<16x64xf32>
    %c2_114 = arith.constant 2 : index
    %c0_115 = arith.constant 0 : index
    %121 = vector.load %arg9[%c2_114, %c0_115] : memref<20x64xf32, #tpu.memory_space<vmem>>, vector<16x64xf32>
    %c3_116 = arith.constant 3 : index
    %c0_117 = arith.constant 0 : index
    %122 = vector.load %arg9[%c3_116, %c0_117] : memref<20x64xf32, #tpu.memory_space<vmem>>, vector<16x64xf32>
    %123 = tpu.concatenate %120, %121, %122 in 1 : vector<16x64xf32>, vector<16x64xf32>, vector<16x64xf32> -> vector<16x192xf32>
    %124 = arith.truncf %123 : vector<16x192xf32> to vector<16x192xbf16>
    %cst_118 = arith.constant dense<0.000000e+00> : vector<16x64xf32>
    %125 = tpu.matmul %124, %117, %cst_118 {dimension_numbers = #tpu.dot_dimension_numbers<[1], [0], [0], [1], [0, 0, 1, 1], [], []>} : vector<16x192xbf16>, vector<192x64xbf16>, vector<16x64xf32> -> vector<16x64xf32>
    %126 = vector.broadcast %119 : vector<1x64xf32> to vector<16x64xf32>
    %127 = arith.addf %125, %126 : vector<16x64xf32>
    %cst_119 = arith.constant 0.000000e+00 : f32
    %128 = vector.broadcast %cst_119 : f32 to vector<16x64xf32>
    %129 = arith.cmpf oge, %127, %128 : vector<16x64xf32>
    %cst_120 = arith.constant 1.000000e-01 : f32
    %130 = vector.broadcast %cst_120 : f32 to vector<16x64xf32>
    %131 = arith.mulf %130, %127 : vector<16x64xf32>
    %132 = arith.select %129, %127, %131 : vector<16x64xi1>, vector<16x64xf32>
    %133 = arith.addf %96, %132 : vector<16x64xf32>
    %c2_121 = arith.constant 2 : index
    %c0_122 = arith.constant 0 : index
    %134 = vector.load %arg9[%c2_121, %c0_122] : memref<20x64xf32, #tpu.memory_space<vmem>>, vector<16x64xf32>
    tpu.vector_store %arg9[%c2_121, %c0_122], %133 {strides = array<i32>} : memref<20x64xf32, #tpu.memory_space<vmem>>, vector<16x64xf32>,
    %c0_123 = arith.constant 0 : index
    %c0_124 = arith.constant 0 : index
    %135 = vector.load %arg6[%c0_123, %c0_124] : memref<192x256xbf16, #tpu.memory_space<vmem>>, vector<192x256xbf16>
    %c0_125 = arith.constant 0 : index
    %c0_126 = arith.constant 0 : index
    %136 = vector.load %arg7[%c0_125, %c0_126] : memref<1x256xf32, #tpu.memory_space<vmem>>, vector<1x256xf32>
    %c1_127 = arith.constant 1 : index
    %c0_128 = arith.constant 0 : index
    %137 = vector.load %arg9[%c1_127, %c0_128] : memref<20x64xf32, #tpu.memory_space<vmem>>, vector<16x64xf32>
    %c2_129 = arith.constant 2 : index
    %c0_130 = arith.constant 0 : index
    %138 = vector.load %arg9[%c2_129, %c0_130] : memref<20x64xf32, #tpu.memory_space<vmem>>, vector<16x64xf32>
    %c3_131 = arith.constant 3 : index
    %c0_132 = arith.constant 0 : index
    %139 = vector.load %arg9[%c3_131, %c0_132] : memref<20x64xf32, #tpu.memory_space<vmem>>, vector<16x64xf32>
    %140 = tpu.concatenate %137, %138, %139 in 1 : vector<16x64xf32>, vector<16x64xf32>, vector<16x64xf32> -> vector<16x192xf32>
    %141 = arith.truncf %140 : vector<16x192xf32> to vector<16x192xbf16>
    %cst_133 = arith.constant dense<0.000000e+00> : vector<16x256xf32>
    %142 = tpu.matmul %141, %135, %cst_133 {dimension_numbers = #tpu.dot_dimension_numbers<[1], [0], [0], [1], [0, 0, 1, 1], [], []>} : vector<16x192xbf16>, vector<192x256xbf16>, vector<16x256xf32> -> vector<16x256xf32>
    %143 = vector.broadcast %136 : vector<1x256xf32> to vector<16x256xf32>
    %144 = arith.addf %142, %143 : vector<16x256xf32>
    %c0_134 = arith.constant 0 : index
    %c0_135 = arith.constant 0 : index
    %c0_136 = arith.constant 0 : index
    %145 = vector.load %arg8[%c0_134, %c0_135, %c0_136] : memref<1x16x256xf32, #tpu.memory_space<vmem>>, vector<1x16x256xf32>
    %146 = vector.shape_cast %145 : vector<1x16x256xf32> to vector<16x256xf32>
    %147 = vector.shape_cast %144 : vector<16x256xf32> to vector<1x16x256xf32>
    tpu.vector_store %arg8[%c0_134, %c0_135, %c0_136], %147 {strides = array<i32>} : memref<1x16x256xf32, #tpu.memory_space<vmem>>, vector<1x16x256xf32>,
    return
  }
  func.func @transform_0(%arg0: i32) -> (i32, i32, i32) {
    %c0_i32 = arith.constant 0 : i32
    %c0_i32_0 = arith.constant 0 : i32
    %c0_i32_1 = arith.constant 0 : i32
    return %arg0, %c0_i32, %c0_i32_0 : i32, i32, i32
  }
  func.func @transform_1(%arg0: i32) -> (i32, i32) {
    %c0_i32 = arith.constant 0 : i32
    %c0_i32_0 = arith.constant 0 : i32
    %c0_i32_1 = arith.constant 0 : i32
    return %c0_i32, %c0_i32_0 : i32, i32
  }
  func.func @transform_2(%arg0: i32) -> (i32, i32) {
    %c0_i32 = arith.constant 0 : i32
    %c0_i32_0 = arith.constant 0 : i32
    %c0_i32_1 = arith.constant 0 : i32
    return %c0_i32, %c0_i32_0 : i32, i32
  }
  func.func @transform_3(%arg0: i32) -> (i32, i32, i32) {
    %c0_i32 = arith.constant 0 : i32
    %c0_i32_0 = arith.constant 0 : i32
    %c0_i32_1 = arith.constant 0 : i32
    %c0_i32_2 = arith.constant 0 : i32
    return %c0_i32, %c0_i32_0, %c0_i32_1 : i32, i32, i32
  }
  func.func @transform_4(%arg0: i32) -> (i32, i32, i32) {
    %c0_i32 = arith.constant 0 : i32
    %c0_i32_0 = arith.constant 0 : i32
    %c0_i32_1 = arith.constant 0 : i32
    %c0_i32_2 = arith.constant 0 : i32
    return %c0_i32, %c0_i32_0, %c0_i32_1 : i32, i32, i32
  }
  func.func @transform_5(%arg0: i32) -> (i32, i32) {
    %c0_i32 = arith.constant 0 : i32
    %c0_i32_0 = arith.constant 0 : i32
    %c0_i32_1 = arith.constant 0 : i32
    return %c0_i32, %c0_i32_0 : i32, i32
  }
  func.func @transform_6(%arg0: i32) -> (i32, i32) {
    %c0_i32 = arith.constant 0 : i32
    %c0_i32_0 = arith.constant 0 : i32
    %c0_i32_1 = arith.constant 0 : i32
    return %c0_i32, %c0_i32_0 : i32, i32
  }
  func.func @transform_7(%arg0: i32) -> (i32, i32, i32) {
    %c0_i32 = arith.constant 0 : i32
    %c0_i32_0 = arith.constant 0 : i32
    %c0_i32_1 = arith.constant 0 : i32
    return %arg0, %c0_i32, %c0_i32_0 : i32, i32, i32
  }
}

</mosaic_0001>

<bundles_post_ra>
// kernel: tpu_custom_call.1
= control target key start
LH: loop header
LB: loop body
LE: loop exit
PB: predicated region body
PF: predicated region fallthrough
CT: control target
= control target key end

     0   :  { %12 = vsyncpa [#allocation4], 0  ;;  %s2942_s0 = inlined_call_operand.vmem [shape: f32[2,16,8], index: 0, kind: input, shape index: {}]   ;;  %s2943_s1 = inlined_call_operand.vmem [shape: bf16[40,64], index: 1, kind: input, shape index: {}]   ;;  %s2944_s2 = inlined_call_operand.vmem [shape: f32[1,64], index: 2, kind: input, shape index: {}]   ;;  %s2945_s3 = inlined_call_operand.vmem [shape: bf16[6,192,64], index: 3, kind: input, shape index: {}]   ;;  %s2946_s4 = inlined_call_operand.vmem [shape: f32[6,1,64], index: 4, kind: input, shape index: {}]   ;;  %s2947_s5 = inlined_call_operand.vmem [shape: bf16[192,256], index: 5, kind: input, shape index: {}]   ;;  %s2948_s6 = inlined_call_operand.vmem [shape: f32[1,256], index: 6, kind: input, shape index: {}]   ;;  %s2949_s7 = inlined_call_operand.hbm [shape: f32[2,16,256], index: 7, kind: output, shape index: {}]  }
   0x1   :  { %14 = vsyncpa [#allocation4 + $0x1], 0  ;;  %s2374_s24 = smov 0   ;;  %s2376_s25 = smov 0  }
   0x2   :  { %s2378_s26 = smov 0   ;;  %s2380_s27 = smov 0  }
   0x3 LB: > { %s2395_s28 = sadd.s32 4294967295, %s2322_s27   ;;  %s1779_s29 = sadd.s32 4294967294, %s2322_s27   ;;  %s2322_s27 = sphi %s2380_s27, %s2955_s27   ;;  %s2318_s26 = sphi %s2378_s26, %s2954_s26   ;;  %s2314_s25 = sphi %s2376_s25, %s2953_s25   ;;  %s2310_s24 = sphi %s2374_s24, %s2952_s24  }
   0x4   : > { %s2399_s30 = sadd.s32 1, %s2322_s27   ;;  %s179_s8 = sadd.s32 1, %s2318_s26 }
   0x5   : > { %s176_s9 = ssub.s32 %s2322_s27, %s2399_s30  ;;  %p189_p0 = scmp.ne.s32.totalorder %s2318_s26, %s2314_s25 }
   0x6   : > { %p177_p1 = scmp.eq.s32.totalorder %s176_s9, 0  ;;  %p190_p2 = scmp.eq.s32.totalorder %s2395_s28, 1 }
   0x7   : > { %p195_p3 = scmp.ne.s32.totalorder %s2314_s25, %s2310_s24  ;;  %p196_p4 = scmp.eq.s32.totalorder %s1779_s29, 1 }
   0x8   : > { %s2410_s10 = scalar_select %p177_p1, %s2318_s26, %s179_s8  }
   0x9   : > { %p2412_p5 = por %p190_p2, %p189_p0  ;;  %p2416_p6 = por %p196_p4, %p195_p3 }
   0xa   : > { %p1782_p7 = scmp.ge.s32.totalorder %s2322_s27, 1  ;;  %p240_p8 = scmp.lt.s32.totalorder %s2322_s27, 3 }
   0xc   : > { %p241_p9 = pnand %p1782_p7, %p240_p8 }
   0xd   : > { %p272_p10 = scmp.lt.s32.totalorder (!%p241_p9), %s2395_s28, 1  ;;  %vm278_vm0 = vcmask (!%p241_p9), 517120   ;;  %v2324_v0 = vmov (!%p241_p9), 0.0   ;;  %v2149_v1 = vld [vmem:[%s2943_s1] sm:$0xff] (!%p241_p9)   ;;  %vm283_vm1 = vcmask (!%p241_p9), 64512   ;;  %v2150_v4 = vld [vmem:[%s2943_s1 + $0x8] sm:$0xff] (!%p241_p9)  }
   0xe   : > { %244 = sbr.rel (%p241_p9) target bundleno = 2850 (0xb22), region = 48  ;;  %279 = vst.msk [vmem:[#allocation2] sm:$0x3] (!%p241_p9), %vm278_vm0, %v2324_v0  ;;  %280 = vst.msk [vmem:[#allocation2 + $0x12] sm:$0x3] (!%p241_p9), %vm278_vm0, %v2324_v0  ;;  %2036 = vmatprep.subr.bf16.mxu0 (!%p241_p9), %v2324_v0  ;;  %vm371_vm2 = vcmask (!%p241_p9), 1043456  }
   0xf   : > { %2037 = vmatpush3.bf16.msra.mxu0 (!%p241_p9), %v2149_v1  ;;  %v2151_v5 = vld [vmem:[%s2943_s1 + $0x10] ss:$0 sps:$4 sm:$0xff] (!%p241_p9)   ;;  %vm2325_vm3 = vmmov (!%p241_p9), 0   ;;  %s2326_s29 = smov (!%p241_p9), 8   ;;  %s2327_s8 = smov (!%p241_p9), 24   ;;  %vm336_vm4 = vcmask (!%p241_p9), 130048  }
  0x10   : > { %2038 = vmatprep.subr.bf16.mxu0 (!%p241_p9), %v2324_v0  ;;  %v373_v6 = vsel (!%p241_p9), %vm371_vm2, %v2151_v5, 0  ;;  %2042 = vmatprep.mubr.msk.bf16.mxu0 (!%p241_p9), %vm2325_vm3, %v2324_v0  ;;  %s2328_s9 = smov (!%p241_p9), 16   ;;  %vm339_vm5 = vcmask (!%p241_p9), 195584   ;;  %vm342_vm6 = vcmask (!%p241_p9), 261120   ;;  %vm367_vm7 = vcmask (!%p241_p9), 326656   ;;  %v2152_v42 = vld [vmem:[%s2945_s3] sm:$0xff] (!%p241_p9)  }
  0x11   : > { %v2330_v43 = vmov (!%p241_p9), 0   ;;  %v2153_v44 = vld [vmem:[%s2945_s3 + $0x8] sm:$0xff] (!%p241_p9)   ;;  %v2154_v45 = vld [vmem:[%s2945_s3 + $0x10] sm:$0xff] (!%p241_p9)   ;;  %v2155_v46 = vld [vmem:[%s2945_s3 + $0x18] sm:$0xff] (!%p241_p9)   ;;  %vm422_vm9 = vcmask (!%p241_p9), 523264   ;;  %s2331_s14 = smov (!%p241_p9), 64  }
  0x12   : > { %549 = vmatprep.subr.bf16.mxu1 (!%p241_p9), %v2330_v43  ;;  %v2156_v47 = vld [vmem:[%s2945_s3 + $0x20] sm:$0xff] (!%p241_p9)   ;;  %v2157_v48 = vld [vmem:[%s2945_s3 + $0x28] sm:$0xff] (!%p241_p9)   ;;  %v2158_v49 = vld [vmem:[%s2945_s3 + $0x30] sm:$0xff] (!%p241_p9)   ;;  %s269_s15 = sand.u32 (!%p241_p9), 1, %s2314_s25   ;;  %s2031_s20 = sshll.u32 (!%p241_p9), %s2395_s28, 9 }
  0x13   : > { %2039 = vmatpush3.bf16.msra.mxu0 (!%p241_p9), %v2150_v4  ;;  %550 = vmatpush1.bf16.msra.mxu1 (!%p241_p9), %v2152_v42  ;;  %v2159_v50 = vld [vmem:[%s2945_s3 + $0x38] sm:$0xff] (!%p241_p9)   ;;  %v2160_v51 = vld [vmem:[%s2945_s3 + $0x40] sm:$0xff] (!%p241_p9)   ;;  %v2161_v52 = vld [vmem:[%s2945_s3 + $0x48] sm:$0xff] (!%p241_p9)   ;;  %s2898_s23 = scalar_lea.hbm (!%p241_p9), %s2949_s7, %s2031_s20 }
  0x14   : > { %2040 = vmatprep.subr.bf16.mxu0 (!%p241_p9), %v2324_v0  ;;  %551 = vmatprep.subr.bf16.mxu1 (!%p241_p9), %v2330_v43  ;;  %v2162_v53 = vld [vmem:[%s2945_s3 + $0x50] sm:$0xff] (!%p241_p9)   ;;  %v1786_v54 = vld [vmem:[%s2944_s2] ss:$0 sm:$0xff] (!%p241_p9)  ;;  %v2163_v0 = vld [vmem:[%s2945_s3 + $0x58] sm:$0xff] (!%p241_p9)  }
  0x15   : > { %s273_s13 = scalar_select %p272_p10, %s2395_s28, 1 }
  0x16   : > { %s2900_s28 = scalar_lea.sflag [#allocation4], %s269_s15 }
  0x17   : > { %s2030_s16 = sshll.u32 %s273_s13, 4  ;;  %2041 = vmatpush3.bf16.msra.mxu0 %v373_v6  ;;  %s2329_s13 = smov 32   ;;  %552 = vmatpush1.bf16.msra.mxu1 %v2153_v44 }
  0x18   : > { %s276_s19 = scalar_lea.vmem %s2942_s0, %s2030_s16  ;;  %724 = vmatprep.subr.bf16.mxu0 %v2330_v43  ;;  %553 = vmatprep.subr.bf16.mxu1 %v2330_v43 }
  0x19   : > { %v281_v2 = vld [vmem:[%s276_s19] sm:$0xff]  ;;  %v282_v3 = vld [vmem:[%s276_s19 + $0x8] sm:$0xff] }
  0x1a   : > { %284 = vst.msk [vmem:[#allocation2 + $0x2] sm:$0xff] %vm283_vm1, %v281_v2  ;;  %285 = vst.msk [vmem:[#allocation2 + $0xa] sm:$0xff] %vm283_vm1, %v282_v3 }
  0x1b   : > { %554 = vmatpush1.bf16.msra.mxu1 %v2154_v45 }
  0x1c   : > { %555 = vmatprep.subr.bf16.mxu1 %v2330_v43 }
  0x1f   : > { %556 = vmatpush1.bf16.msra.mxu1 %v2155_v46 }
  0x20   : > { %557 = vmatprep.subr.bf16.mxu1 %v2330_v43 }
  0x21   : > { %v294_v7 = vld [vmem:[#allocation2 + $0x1] sm:$0xff]  ;;  %v295_v8 = vld [vmem:[#allocation2 + $0x9] sm:$0xff] }
  0x22   : > { %v298_v9 = vld [vmem:[#allocation2 + $0x3] sm:$0xff]  ;;  %v2094_v10 = vpack.i.bf16 %v295_v8, %v294_v7  ;;  %v299_v11 = vld [vmem:[#allocation2 + $0xb] sm:$0xff] }
  0x23   : > { %v296_v12 = vld [vmem:[#allocation2 + $0x2] sm:$0xff]  ;;  %v297_v13 = vld [vmem:[#allocation2 + $0xa] sm:$0xff]  ;;  %v2104_v14 = vpack.i.bf16 %v299_v11, %v298_v9  ;;  %558 = vmatpush1.bf16.msra.mxu1 %v2156_v47 }
  0x24   : > { %v300_v15 = vld [vmem:[#allocation2 + $0x4] sm:$0xff]  ;;  %v301_v16 = vld [vmem:[#allocation2 + $0xc] sm:$0xff]  ;;  %2095 = vrot.lane.b32.xlu0 %v2094_v10, %s2326_s29  ;;  %v2099_v17 = vpack.i.bf16 %v297_v13, %v296_v12  ;;  %559 = vmatprep.subr.bf16.mxu1 %v2330_v43 }
  0x25   : > { %2105 = vrot.lane.b32.xlu1 %v2104_v14, %s2327_s8  ;;  %v2109_v18 = vpack.i.bf16 %v301_v16, %v300_v15  ;;  %v292_v23 = vld [vmem:[#allocation2] sm:$0xff]  ;;  %v293_v24 = vld [vmem:[#allocation2 + $0x8] sm:$0xff]  ;;  %s2332_s8 = smov [#allocation3]  }
  0x26   : > { %v2164_v16 = vld [vmem:[%s2945_s3 + $0x60] sm:$0xff]  }
  0x27   : > { %560 = vmatpush1.bf16.msra.mxu1 %v2157_v48 }
  0x28   : > { %2100 = vrot.lane.b32.xlu0 %v2099_v17, %s2328_s9  ;;  %561 = vmatprep.subr.bf16.mxu1 %v2330_v43  ;;  %v2165_v17 = vld [vmem:[%s2945_s3 + $0x68] sm:$0xff]  }
  0x29   : > { %2110 = vrot.lane.b32.xlu1 %v2109_v18, %s2329_s13  ;;  %v2166_v18 = vld [vmem:[%s2945_s3 + $0x70] sm:$0xff]   ;;  %s2264_s13 = sshll.u32 %s2332_s8, 4  ;;  %s2265_s13 = int_to_ptr.vmem [resolvable:$false] %s2264_s13 }
  0x2a   : > { %s2266_s16 = scalar_lea.vmem %s2265_s13, 1024 }
  0x2b   : > { %562 = vmatpush1.bf16.msra.mxu1 %v2158_v49 }
  0x2c   : > { %563 = vmatprep.subr.bf16.mxu1 %v2330_v43 }
  0x2f   : > { %564 = vmatpush1.bf16.msra.mxu1 %v2159_v50 }
  0x30   : > { %565 = vmatprep.subr.bf16.mxu1 %v2330_v43 }
  0x33   : > { %566 = vmatpush1.bf16.msra.mxu1 %v2160_v51 }
  0x34   : > { %567 = vmatprep.subr.bf16.mxu1 %v2330_v43 }
  0x37   : > { %568 = vmatpush1.bf16.msra.mxu1 %v2161_v52 }
  0x38   : > { %569 = vmatprep.subr.bf16.mxu1 %v2330_v43 }
  0x3b   : > { %570 = vmatpush1.bf16.msra.mxu1 %v2162_v53 }
  0x3c   : > { %571 = vmatprep.subr.bf16.mxu1 %v2330_v43 }
  0x3f   : > { %572 = vmatpush1.bf16.msra.mxu1 %v2163_v0  ;;  %v2185_v0 = vld [vmem:[%s2945_s3 + $0x108] sm:$0xff]  }
  0x40   : > { %901 = vmatprep.subr.bf16.mxu1 %v2330_v43 }
  0x96   : > { %v2096_v19 = vpop.permute.xlu0 %2095 }
  0x97   : > { %v2106_v20 = vpop.permute.xlu1 %2105  ;;  %v2098_v21 = vunpack.i.h.bf16 %v2096_v19  ;;  %v2097_v22 = vunpack.i.l.bf16 %v2096_v19  ;;  %v2167_v19 = vld [vmem:[%s2945_s3 + $0x78] sm:$0xff]  }
  0x98   : > { %v2108_v26 = vunpack.i.h.bf16 %v2106_v20  ;;  %v2107_v27 = vunpack.i.l.bf16 %v2106_v20  ;;  %v2168_v20 = vld [vmem:[%s2945_s3 + $0x80] sm:$0xff]  }
  0x99   : > { %v334_v31 = vsel %vm283_vm1, %v292_v23, %v2097_v22  ;;  %v335_v32 = vsel %vm283_vm1, %v293_v24, %v2098_v21  ;;  %v2169_v21 = vld [vmem:[%s2945_s3 + $0x88] sm:$0xff]   ;;  %v2170_v22 = vld [vmem:[%s2945_s3 + $0x90] sm:$0xff]   ;;  %v2171_v23 = vld [vmem:[%s2945_s3 + $0x98] sm:$0xff]  }
  0x9a   : > { %v2101_v25 = vpop.permute.xlu0 %2100  ;;  %v2172_v24 = vld [vmem:[%s2945_s3 + $0xa0] sm:$0xff]  }
  0x9b   : > { %v2103_v28 = vunpack.i.h.bf16 %v2101_v25  ;;  %v2102_v29 = vunpack.i.l.bf16 %v2101_v25  ;;  %v2111_v30 = vpop.permute.xlu1 %2110  ;;  %v2173_v25 = vld [vmem:[%s2945_s3 + $0xa8] sm:$0xff]  }
  0x9c   : > { %v2113_v33 = vunpack.i.h.bf16 %v2111_v30  ;;  %v2112_v34 = vunpack.i.l.bf16 %v2111_v30 }
  0x9d   : > { %v337_v35 = vsel %vm336_vm4, %v334_v31, %v2102_v29  ;;  %v338_v36 = vsel %vm336_vm4, %v335_v32, %v2103_v28 }
  0x9e   : > { %v340_v37 = vsel %vm339_vm5, %v337_v35, %v2107_v27  ;;  %v341_v38 = vsel %vm339_vm5, %v338_v36, %v2108_v26  ;;  %v2174_v26 = vld [vmem:[%s2945_s3 + $0xb0] sm:$0xff]   ;;  %v1791_v27 = vld [vmem:[%s2946_s4] ss:$0 sm:$0xff] }
  0x9f   : > { %v343_v39 = vsel %vm342_vm6, %v340_v37, %v2112_v34  ;;  %v344_v40 = vsel %vm342_vm6, %v341_v38, %v2113_v33  ;;  %v2175_v37 = vld [vmem:[%s2945_s3 + $0xb8] sm:$0xff]  }
  0xa0   : > { %v345_v41 = vpack.c.bf16 %v344_v40, %v343_v39 }
  0xa2   : > { %2043 = vmatmul.mubr.msk.bf16.vlgmr.msra.gmra.mrb[0].mxu0 %vm367_vm7, %v345_v41 }
  0xa3   : > { %725 = vmatpush1.bf16.msra.mxu0 %v2164_v16  ;;  %v2187_v16 = vld [vmem:[%s2945_s3 + $0x118] sm:$0xff]  }
  0xa4   : > { %726 = vmatprep.subr.bf16.mxu0 %v2330_v43 }
  0xa7   : > { %727 = vmatpush1.bf16.msra.mxu0 %v2165_v17 }
  0xa8   : > { %728 = vmatprep.subr.bf16.mxu0 %v2330_v43 }
  0xab   : > { %729 = vmatpush1.bf16.msra.mxu0 %v2166_v18 }
  0xac   : > { %730 = vmatprep.subr.bf16.mxu0 %v2330_v43 }
  0xaf   : > { %731 = vmatpush1.bf16.msra.mxu0 %v2167_v19 }
  0xb0   : > { %732 = vmatprep.subr.bf16.mxu0 %v2330_v43 }
  0xb3   : > { %733 = vmatpush1.bf16.msra.mxu0 %v2168_v20 }
  0xb4   : > { %734 = vmatprep.subr.bf16.mxu0 %v2330_v43 }
  0xb7   : > { %735 = vmatpush1.bf16.msra.mxu0 %v2169_v21 }
  0xb8   : > { %736 = vmatprep.subr.bf16.mxu0 %v2330_v43 }
  0xbb   : > { %737 = vmatpush1.bf16.msra.mxu0 %v2170_v22 }
  0xbc   : > { %738 = vmatprep.subr.bf16.mxu0 %v2330_v43 }
  0xbf   : > { %739 = vmatpush1.bf16.msra.mxu0 %v2171_v23 }
  0xc0   : > { %740 = vmatprep.subr.bf16.mxu0 %v2330_v43 }
  0xc3   : > { %741 = vmatpush1.bf16.msra.mxu0 %v2172_v24 }
  0xc4   : > { %742 = vmatprep.subr.bf16.mxu0 %v2330_v43 }
  0xc7   : > { %743 = vmatpush1.bf16.msra.mxu0 %v2173_v25 }
  0xc8   : > { %744 = vmatprep.subr.bf16.mxu0 %v2330_v43 }
  0xcb   : > { %745 = vmatpush1.bf16.msra.mxu0 %v2174_v26 }
  0xcc   : > { %746 = vmatprep.subr.bf16.mxu0 %v2330_v43 }
  0xcf   : > { %747 = vmatpush1.bf16.msra.mxu0 %v2175_v37  ;;  %v2196_v37 = vld [vmem:[%s2945_s3 + $0x160] sm:$0xff]  }
  0xd0   : > { %1076 = vmatprep.subr.bf16.mxu0 %v2330_v43 }
 0x175   : > { %v409_v55 = vpop.f32.mrb[0].mxu0 }
 0x176   : > { %v410_v56 = vadd.f32 %v1786_v54, %v409_v55  ;;  %v2044_v57 = vpop.f32.mrb[1].mxu0  ;;  %v2177_v55 = vld [vmem:[%s2945_s3 + $0xc8] sm:$0xff]  }
 0x177   : > { %v412_v58 = vpop.f32.mrb[2].mxu0  ;;  %v2179_v57 = vld [vmem:[%s2945_s3 + $0xd8] sm:$0xff]  }
 0x178   : > { %vm416_vm8 = vcmp.ge.f32.partialorder %v410_v56, 0.0  ;;  %v418_v59 = vmul.f32 0.1, %v410_v56  ;;  %v413_v60 = vadd.f32 %v1786_v54, %v412_v58  ;;  %v2045_v61 = vpop.f32.mrb[3].mxu0  ;;  %v2176_v54 = vld [vmem:[%s2945_s3 + $0xc0] sm:$0xff]  }
 0x179   : > { %v2180_v58 = vld [vmem:[%s2945_s3 + $0xe0] sm:$0xff]   ;;  %v2183_v61 = vld [vmem:[%s2945_s3 + $0xf8] sm:$0xff]  }
 0x17a   : > { %v2490_v62 = vsel %vm416_vm8, %v410_v56, %v418_v59  ;;  %vm417_vm10 = vcmp.ge.f32.partialorder %v413_v60, 0.0  ;;  %v419_v63 = vmul.f32 0.1, %v413_v60  ;;  %v2178_v56 = vld [vmem:[%s2945_s3 + $0xd0] sm:$0xff]   ;;  %v2181_v59 = vld [vmem:[%s2945_s3 + $0xe8] sm:$0xff]  }
 0x17b   : > { %423 = vst.msk [vmem:[#allocation2 + $0x2] sm:$0xff] %vm422_vm9, %v2490_v62 }
 0x17c   : > { %v2497_v1 = vsel %vm417_vm10, %v413_v60, %v419_v63  ;;  %v2182_v60 = vld [vmem:[%s2945_s3 + $0xf0] sm:$0xff]   ;;  %v2184_v63 = vld [vmem:[%s2945_s3 + $0x100] sm:$0xff]  }
 0x17d   : > { %424 = vst.msk [vmem:[#allocation2 + $0xa] sm:$0xff] %vm422_vm9, %v2497_v1 }
 0x182   : > { %v452_v2 = vld [vmem:[#allocation2 + $0x2] sm:$0xff] }
 0x183   : > { %v450_v11 = vld [vmem:[#allocation2 + $0x1] sm:$0xff] }
 0x184   : > { %v454_v3 = vld [vmem:[#allocation2 + $0x3] sm:$0xff]  ;;  %v455_v4 = vld [vmem:[#allocation2 + $0xb] sm:$0xff] }
 0x185   : > { %v453_v5 = vld [vmem:[#allocation2 + $0xa] sm:$0xff]  ;;  %v467_v6 = vpack.c.bf16 %v455_v4, %v454_v3  ;;  %v1830_v3 = vld [vmem:[%s2946_s4 + $0x1] ss:$0 sm:$0xff] }
 0x186   : > { %v2114_v7 = vpack.i.bf16 %v453_v5, %v452_v2  ;;  %v451_v12 = vld [vmem:[#allocation2 + $0x9] sm:$0xff] }
 0x187   : > { %1804 = vmatprep.mubr.msk.bf16.mxu1 %vm422_vm9, %v467_v6  ;;  %v2186_v2 = vld [vmem:[%s2945_s3 + $0x110] sm:$0xff]  }
 0x188   : > { %2115 = vrot.lane.b32.xlu0 %v2114_v7, %s2331_s14 }
 0x1fa   : > { %v2116_v8 = vpop.permute.xlu0 %2115 }
 0x1fb   : > { %v2118_v9 = vunpack.i.h.bf16 %v2116_v8  ;;  %v2117_v10 = vunpack.i.l.bf16 %v2116_v8 }
 0x1fd   : > { %v464_v13 = vsel %vm422_vm9, %v450_v11, %v2117_v10  ;;  %v465_v14 = vsel %vm422_vm9, %v451_v12, %v2118_v9 }
 0x1fe   : > { %v466_v15 = vpack.c.bf16 %v465_v14, %v464_v13 }
 0x200   : > { %582 = vmatmul.mubr.bf16.vlgmr.msra.gmra.mrb[0].mxu1 %v466_v15 }
 0x201   : > { %902 = vmatpush1.bf16.msra.mxu1 %v2176_v54 }
 0x202   : > { %903 = vmatprep.subr.bf16.mxu1 %v2330_v43 }
 0x205   : > { %904 = vmatpush1.bf16.msra.mxu1 %v2177_v55 }
 0x206   : > { %905 = vmatprep.subr.bf16.mxu1 %v2330_v43 }
 0x209   : > { %906 = vmatpush1.bf16.msra.mxu1 %v2178_v56 }
 0x20a   : > { %907 = vmatprep.subr.bf16.mxu1 %v2330_v43 }
 0x20d   : > { %908 = vmatpush1.bf16.msra.mxu1 %v2179_v57 }
 0x20e   : > { %909 = vmatprep.subr.bf16.mxu1 %v2330_v43 }
 0x211   : > { %910 = vmatpush1.bf16.msra.mxu1 %v2180_v58 }
 0x212   : > { %911 = vmatprep.subr.bf16.mxu1 %v2330_v43 }
 0x215   : > { %912 = vmatpush1.bf16.msra.mxu1 %v2181_v59 }
 0x216   : > { %913 = vmatprep.subr.bf16.mxu1 %v2330_v43 }
 0x219   : > { %914 = vmatpush1.bf16.msra.mxu1 %v2182_v60 }
 0x21a   : > { %915 = vmatprep.subr.bf16.mxu1 %v2330_v43 }
 0x21d   : > { %916 = vmatpush1.bf16.msra.mxu1 %v2183_v61 }
 0x21e   : > { %917 = vmatprep.subr.bf16.mxu1 %v2330_v43 }
 0x221   : > { %918 = vmatpush1.bf16.msra.mxu1 %v2184_v63 }
 0x222   : > { %919 = vmatprep.subr.bf16.mxu1 %v2330_v43 }
 0x225   : > { %920 = vmatpush1.bf16.msra.mxu1 %v2185_v0 }
 0x226   : > { %921 = vmatprep.subr.bf16.mxu1 %v2330_v43 }
 0x229   : > { %922 = vmatpush1.bf16.msra.mxu1 %v2186_v2 }
 0x22a   : > { %923 = vmatprep.subr.bf16.mxu1 %v2330_v43 }
 0x22d   : > { %924 = vmatpush1.bf16.msra.mxu1 %v2187_v16  ;;  %v2209_v16 = vld [vmem:[%s2945_s3 + $0x1c8] sm:$0xff]  }
 0x22e   : > { %1253 = vmatprep.subr.bf16.mxu1 %v2330_v43 }
 0x2d3   : > { %v583_v28 = vpop.f32.mrb[0].mxu1 }
 0x2d4   : > { %v584_v29 = vadd.f32 %v1791_v27, %v583_v28  ;;  %v585_v30 = vpop.f32.mrb[1].mxu1 }
 0x2d5   : > { %v586_v31 = vpop.f32.mrb[2].mxu1  ;;  %v2189_v30 = vld [vmem:[%s2945_s3 + $0x128] sm:$0xff]  }
 0x2d6   : > { %vm590_vm11 = vcmp.ge.f32.partialorder %v584_v29, 0.0  ;;  %v592_v32 = vmul.f32 0.1, %v584_v29  ;;  %v587_v33 = vadd.f32 %v1791_v27, %v586_v31  ;;  %v588_v34 = vpop.f32.mrb[3].mxu1  ;;  %v2190_v31 = vld [vmem:[%s2945_s3 + $0x130] sm:$0xff]  }
 0x2d7   : > { %v2193_v34 = vld [vmem:[%s2945_s3 + $0x148] sm:$0xff]  }
 0x2d8   : > { %v594_v35 = vsel %vm590_vm11, %v584_v29, %v592_v32  ;;  %vm591_vm12 = vcmp.ge.f32.partialorder %v587_v33, 0.0  ;;  %v593_v36 = vmul.f32 0.1, %v587_v33  ;;  %v2188_v29 = vld [vmem:[%s2945_s3 + $0x120] sm:$0xff]   ;;  %v2191_v32 = vld [vmem:[%s2945_s3 + $0x138] sm:$0xff]  }
 0x2d9   : > { %596 = vst.msk [vmem:[#allocation2 + $0x2] sm:$0xff] %vm422_vm9, %v594_v35  ;;  %v2194_v35 = vld [vmem:[%s2945_s3 + $0x150] sm:$0xff]  }
 0x2da   : > { %v595_v38 = vsel %vm591_vm12, %v587_v33, %v593_v36  ;;  %v2192_v33 = vld [vmem:[%s2945_s3 + $0x140] sm:$0xff]   ;;  %v2195_v36 = vld [vmem:[%s2945_s3 + $0x158] sm:$0xff]  }
 0x2db   : > { %597 = vst.msk [vmem:[#allocation2 + $0xa] sm:$0xff] %vm422_vm9, %v595_v38  ;;  %v2197_v38 = vld [vmem:[%s2945_s3 + $0x168] sm:$0xff]  }
 0x2e0   : > { %v627_v39 = vld [vmem:[#allocation2 + $0x2] sm:$0xff] }
 0x2e1   : > { %v625_v49 = vld [vmem:[#allocation2 + $0x1] sm:$0xff] }
 0x2e2   : > { %v629_v40 = vld [vmem:[#allocation2 + $0x3] sm:$0xff]  ;;  %v630_v41 = vld [vmem:[#allocation2 + $0xb] sm:$0xff] }
 0x2e3   : > { %v628_v42 = vld [vmem:[#allocation2 + $0xa] sm:$0xff]  ;;  %v642_v44 = vpack.c.bf16 %v630_v41, %v629_v40  ;;  %v1869_v40 = vld [vmem:[%s2946_s4 + $0x2] ss:$0 sm:$0xff] }
 0x2e4   : > { %v2119_v45 = vpack.i.bf16 %v628_v42, %v627_v39  ;;  %v626_v50 = vld [vmem:[#allocation2 + $0x9] sm:$0xff] }
 0x2e5   : > { %1843 = vmatprep.mubr.msk.bf16.mxu0 %vm422_vm9, %v642_v44  ;;  %v2198_v39 = vld [vmem:[%s2945_s3 + $0x170] sm:$0xff]  }
 0x2e6   : > { %2120 = vrot.lane.b32.xlu1 %v2119_v45, %s2331_s14 }
 0x358   : > { %v2121_v46 = vpop.permute.xlu1 %2120 }
 0x359   : > { %v2123_v47 = vunpack.i.h.bf16 %v2121_v46  ;;  %v2122_v48 = vunpack.i.l.bf16 %v2121_v46 }
 0x35b   : > { %v639_v51 = vsel %vm422_vm9, %v625_v49, %v2122_v48  ;;  %v640_v52 = vsel %vm422_vm9, %v626_v50, %v2123_v47 }
 0x35c   : > { %v641_v53 = vpack.c.bf16 %v640_v52, %v639_v51  ;;  %v2199_v51 = vld [vmem:[%s2945_s3 + $0x178] sm:$0xff]  }
 0x35e   : > { %757 = vmatmul.mubr.bf16.vlgmr.msra.gmra.mrb[4].mxu0 %v641_v53 }
 0x35f   : > { %1077 = vmatpush1.bf16.msra.mxu0 %v2188_v29  ;;  %v2211_v29 = vld [vmem:[%s2945_s3 + $0x1d8] sm:$0xff]  }
 0x360   : > { %1078 = vmatprep.subr.bf16.mxu0 %v2330_v43 }
 0x363   : > { %1079 = vmatpush1.bf16.msra.mxu0 %v2189_v30 }
 0x364   : > { %1080 = vmatprep.subr.bf16.mxu0 %v2330_v43 }
 0x367   : > { %1081 = vmatpush1.bf16.msra.mxu0 %v2190_v31 }
 0x368   : > { %1082 = vmatprep.subr.bf16.mxu0 %v2330_v43 }
 0x36b   : > { %1083 = vmatpush1.bf16.msra.mxu0 %v2191_v32 }
 0x36c   : > { %1084 = vmatprep.subr.bf16.mxu0 %v2330_v43 }
 0x36f   : > { %1085 = vmatpush1.bf16.msra.mxu0 %v2192_v33 }
 0x370   : > { %1086 = vmatprep.subr.bf16.mxu0 %v2330_v43 }
 0x373   : > { %1087 = vmatpush1.bf16.msra.mxu0 %v2193_v34 }
 0x374   : > { %1088 = vmatprep.subr.bf16.mxu0 %v2330_v43 }
 0x377   : > { %1089 = vmatpush1.bf16.msra.mxu0 %v2194_v35 }
 0x378   : > { %1090 = vmatprep.subr.bf16.mxu0 %v2330_v43 }
 0x37b   : > { %1091 = vmatpush1.bf16.msra.mxu0 %v2195_v36 }
 0x37c   : > { %1092 = vmatprep.subr.bf16.mxu0 %v2330_v43 }
 0x37f   : > { %1093 = vmatpush1.bf16.msra.mxu0 %v2196_v37 }
 0x380   : > { %1094 = vmatprep.subr.bf16.mxu0 %v2330_v43 }
 0x383   : > { %1095 = vmatpush1.bf16.msra.mxu0 %v2197_v38 }
 0x384   : > { %1096 = vmatprep.subr.bf16.mxu0 %v2330_v43 }
 0x387   : > { %1097 = vmatpush1.bf16.msra.mxu0 %v2198_v39 }
 0x388   : > { %1098 = vmatprep.subr.bf16.mxu0 %v2330_v43 }
 0x38b   : > { %1099 = vmatpush1.bf16.msra.mxu0 %v2199_v51  ;;  %v2220_v51 = vld [vmem:[%s2945_s3 + $0x220] sm:$0xff]  }
 0x38c   : > { %1428 = vmatprep.subr.bf16.mxu0 %v2330_v43 }
 0x431   : > { %v758_v4 = vpop.f32.mrb[4].mxu0 }
 0x432   : > { %v759_v5 = vadd.f32 %v1830_v3, %v758_v4  ;;  %v760_v6 = vpop.f32.mrb[5].mxu0 }
 0x433   : > { %v761_v7 = vpop.f32.mrb[6].mxu0  ;;  %v2201_v6 = vld [vmem:[%s2945_s3 + $0x188] sm:$0xff]  }
 0x434   : > { %vm765_vm13 = vcmp.ge.f32.partialorder %v759_v5, 0.0  ;;  %v767_v8 = vmul.f32 0.1, %v759_v5  ;;  %v762_v9 = vadd.f32 %v1830_v3, %v761_v7  ;;  %v763_v10 = vpop.f32.mrb[7].mxu0  ;;  %v2202_v7 = vld [vmem:[%s2945_s3 + $0x190] sm:$0xff]  }
 0x435   : > { %v2205_v10 = vld [vmem:[%s2945_s3 + $0x1a8] sm:$0xff]  }
 0x436   : > { %v769_v11 = vsel %vm765_vm13, %v759_v5, %v767_v8  ;;  %vm766_vm14 = vcmp.ge.f32.partialorder %v762_v9, 0.0  ;;  %v768_v12 = vmul.f32 0.1, %v762_v9  ;;  %v2200_v5 = vld [vmem:[%s2945_s3 + $0x180] sm:$0xff]   ;;  %v2203_v8 = vld [vmem:[%s2945_s3 + $0x198] sm:$0xff]  }
 0x437   : > { %v2611_v13 = vadd.f32 %v769_v11, %v2490_v62  ;;  %v2206_v11 = vld [vmem:[%s2945_s3 + $0x1b0] sm:$0xff]  }
 0x438   : > { %v770_v14 = vsel %vm766_vm14, %v762_v9, %v768_v12  ;;  %v2204_v9 = vld [vmem:[%s2945_s3 + $0x1a0] sm:$0xff]   ;;  %v2207_v12 = vld [vmem:[%s2945_s3 + $0x1b8] sm:$0xff]  }
 0x439   : > { %773 = vst.msk [vmem:[#allocation2 + $0x2] sm:$0xff] %vm422_vm9, %v2611_v13  ;;  %v2616_v15 = vadd.f32 %v770_v14, %v2497_v1  ;;  %v2208_v14 = vld [vmem:[%s2945_s3 + $0x1c0] sm:$0xff]  }
 0x43b   : > { %774 = vst.msk [vmem:[#allocation2 + $0xa] sm:$0xff] %vm422_vm9, %v2616_v15 }
 0x440   : > { %v804_v17 = vld [vmem:[#allocation2 + $0x2] sm:$0xff] }
 0x441   : > { %v802_v24 = vld [vmem:[#allocation2 + $0x1] sm:$0xff] }
 0x442   : > { %v806_v62 = vld [vmem:[#allocation2 + $0x3] sm:$0xff]  ;;  %v807_v18 = vld [vmem:[#allocation2 + $0xb] sm:$0xff] }
 0x443   : > { %v805_v19 = vld [vmem:[#allocation2 + $0xa] sm:$0xff]  ;;  %v819_v20 = vpack.c.bf16 %v807_v18, %v806_v62  ;;  %v1908_v62 = vld [vmem:[%s2946_s4 + $0x3] ss:$0 sm:$0xff] }
 0x444   : > { %v2124_v21 = vpack.i.bf16 %v805_v19, %v804_v17  ;;  %v803_v25 = vld [vmem:[#allocation2 + $0x9] sm:$0xff] }
 0x445   : > { %1882 = vmatprep.mubr.msk.bf16.mxu1 %vm422_vm9, %v819_v20  ;;  %v2210_v17 = vld [vmem:[%s2945_s3 + $0x1d0] sm:$0xff]  }
 0x446   : > { %2125 = vrot.lane.b32.xlu0 %v2124_v21, %s2331_s14 }
 0x4b8   : > { %v2126_v1 = vpop.permute.xlu0 %2125 }
 0x4b9   : > { %v2128_v22 = vunpack.i.h.bf16 %v2126_v1  ;;  %v2127_v23 = vunpack.i.l.bf16 %v2126_v1 }
 0x4bb   : > { %v816_v26 = vsel %vm422_vm9, %v802_v24, %v2127_v23  ;;  %v817_v27 = vsel %vm422_vm9, %v803_v25, %v2128_v22 }
 0x4bc   : > { %v818_v28 = vpack.c.bf16 %v817_v27, %v816_v26 }
 0x4be   : > { %934 = vmatmul.mubr.bf16.vlgmr.msra.gmra.mrb[4].mxu1 %v818_v28 }
 0x4bf   : > { %1254 = vmatpush1.bf16.msra.mxu1 %v2200_v5 }
 0x4c0   : > { %1255 = vmatprep.subr.bf16.mxu1 %v2330_v43 }
 0x4c3   : > { %1256 = vmatpush1.bf16.msra.mxu1 %v2201_v6 }
 0x4c4   : > { %1257 = vmatprep.subr.bf16.mxu1 %v2330_v43 }
 0x4c7   : > { %1258 = vmatpush1.bf16.msra.mxu1 %v2202_v7 }
 0x4c8   : > { %1259 = vmatprep.subr.bf16.mxu1 %v2330_v43 }
 0x4cb   : > { %1260 = vmatpush1.bf16.msra.mxu1 %v2203_v8 }
 0x4cc   : > { %1261 = vmatprep.subr.bf16.mxu1 %v2330_v43 }
 0x4cf   : > { %1262 = vmatpush1.bf16.msra.mxu1 %v2204_v9 }
 0x4d0   : > { %1263 = vmatprep.subr.bf16.mxu1 %v2330_v43 }
 0x4d3   : > { %1264 = vmatpush1.bf16.msra.mxu1 %v2205_v10 }
 0x4d4   : > { %1265 = vmatprep.subr.bf16.mxu1 %v2330_v43 }
 0x4d7   : > { %1266 = vmatpush1.bf16.msra.mxu1 %v2206_v11 }
 0x4d8   : > { %1267 = vmatprep.subr.bf16.mxu1 %v2330_v43 }
 0x4db   : > { %1268 = vmatpush1.bf16.msra.mxu1 %v2207_v12 }
 0x4dc   : > { %1269 = vmatprep.subr.bf16.mxu1 %v2330_v43 }
 0x4df   : > { %1270 = vmatpush1.bf16.msra.mxu1 %v2208_v14 }
 0x4e0   : > { %1271 = vmatprep.subr.bf16.mxu1 %v2330_v43 }
 0x4e3   : > { %1272 = vmatpush1.bf16.msra.mxu1 %v2209_v16 }
 0x4e4   : > { %1273 = vmatprep.subr.bf16.mxu1 %v2330_v43 }
 0x4e7   : > { %1274 = vmatpush1.bf16.msra.mxu1 %v2210_v17 }
 0x4e8   : > { %1275 = vmatprep.subr.bf16.mxu1 %v2330_v43 }
 0x4eb   : > { %1276 = vmatpush1.bf16.msra.mxu1 %v2211_v29  ;;  %v2241_v29 = vld [vmem:[%s2947_s5 + $0x54] ss:$8 sps:$4 sm:$0xff]  }
 0x591   : > { %v935_v41 = vpop.f32.mrb[4].mxu1 }
 0x592   : > { %v936_v42 = vadd.f32 %v1869_v40, %v935_v41  ;;  %v937_v44 = vpop.f32.mrb[5].mxu1 }
 0x593   : > { %v938_v45 = vpop.f32.mrb[6].mxu1  ;;  %v2213_v44 = vld [vmem:[%s2945_s3 + $0x1e8] sm:$0xff]  }
 0x594   : > { %vm942_vm15 = vcmp.ge.f32.partialorder %v936_v42, 0.0  ;;  %v944_v46 = vmul.f32 0.1, %v936_v42  ;;  %v939_v47 = vadd.f32 %v1869_v40, %v938_v45  ;;  %v940_v48 = vpop.f32.mrb[7].mxu1  ;;  %v2214_v45 = vld [vmem:[%s2945_s3 + $0x1f0] sm:$0xff]  }
 0x595   : > { %v2217_v48 = vld [vmem:[%s2945_s3 + $0x208] sm:$0xff]  }
 0x596   : > { %v946_v49 = vsel %vm942_vm15, %v936_v42, %v944_v46  ;;  %vm943_vm0 = vcmp.ge.f32.partialorder %v939_v47, 0.0  ;;  %v945_v50 = vmul.f32 0.1, %v939_v47  ;;  %v2212_v42 = vld [vmem:[%s2945_s3 + $0x1e0] sm:$0xff]   ;;  %v2215_v46 = vld [vmem:[%s2945_s3 + $0x1f8] sm:$0xff]  }
 0x597   : > { %948 = vst.msk [vmem:[#allocation2 + $0x2] sm:$0xff] %vm422_vm9, %v946_v49  ;;  %v2218_v49 = vld [vmem:[%s2945_s3 + $0x210] sm:$0xff]  }
 0x598   : > { %v947_v52 = vsel %vm943_vm0, %v939_v47, %v945_v50  ;;  %v2216_v47 = vld [vmem:[%s2945_s3 + $0x200] sm:$0xff]   ;;  %v2219_v50 = vld [vmem:[%s2945_s3 + $0x218] sm:$0xff]  }
 0x599   : > { %949 = vst.msk [vmem:[#allocation2 + $0xa] sm:$0xff] %vm422_vm9, %v947_v52  ;;  %v2221_v52 = vld [vmem:[%s2945_s3 + $0x228] sm:$0xff]  }
 0x59e   : > { %v979_v53 = vld [vmem:[#allocation2 + $0x2] sm:$0xff] }
 0x59f   : > { %v977_v63 = vld [vmem:[#allocation2 + $0x1] sm:$0xff] }
 0x5a0   : > { %v981_v54 = vld [vmem:[#allocation2 + $0x3] sm:$0xff]  ;;  %v982_v55 = vld [vmem:[#allocation2 + $0xb] sm:$0xff] }
 0x5a1   : > { %v980_v56 = vld [vmem:[#allocation2 + $0xa] sm:$0xff]  ;;  %v994_v57 = vpack.c.bf16 %v982_v55, %v981_v54  ;;  %v1947_v54 = vld [vmem:[%s2946_s4 + $0x4] ss:$0 sm:$0xff] }
 0x5a2   : > { %v2129_v58 = vpack.i.bf16 %v980_v56, %v979_v53  ;;  %v978_v0 = vld [vmem:[#allocation2 + $0x9] sm:$0xff] }
 0x5a3   : > { %1921 = vmatprep.mubr.msk.bf16.mxu0 %vm422_vm9, %v994_v57  ;;  %v2222_v53 = vld [vmem:[%s2945_s3 + $0x230] sm:$0xff]  }
 0x5a4   : > { %2130 = vrot.lane.b32.xlu1 %v2129_v58, %s2331_s14 }
 0x616   : > { %v2131_v59 = vpop.permute.xlu1 %2130 }
 0x617   : > { %v2133_v60 = vunpack.i.h.bf16 %v2131_v59  ;;  %v2132_v61 = vunpack.i.l.bf16 %v2131_v59 }
 0x619   : > { %v991_v2 = vsel %vm422_vm9, %v977_v63, %v2132_v61  ;;  %v992_v3 = vsel %vm422_vm9, %v978_v0, %v2133_v60 }
 0x61a   : > { %v993_v4 = vpack.c.bf16 %v992_v3, %v991_v2 }
 0x61c   : > { %1109 = vmatmul.mubr.bf16.vlgmr.msra.gmra.mrb[8].mxu0 %v993_v4 }
 0x61d   : > { %1429 = vmatpush1.bf16.msra.mxu0 %v2212_v42 }
 0x61e   : > { %1430 = vmatprep.subr.bf16.mxu0 %v2330_v43 }
 0x621   : > { %1431 = vmatpush1.bf16.msra.mxu0 %v2213_v44 }
 0x622   : > { %1432 = vmatprep.subr.bf16.mxu0 %v2330_v43 }
 0x625   : > { %1433 = vmatpush1.bf16.msra.mxu0 %v2214_v45 }
 0x626   : > { %1434 = vmatprep.subr.bf16.mxu0 %v2330_v43 }
 0x629   : > { %1435 = vmatpush1.bf16.msra.mxu0 %v2215_v46 }
 0x62a   : > { %1436 = vmatprep.subr.bf16.mxu0 %v2330_v43 }
 0x62d   : > { %1437 = vmatpush1.bf16.msra.mxu0 %v2216_v47 }
 0x62e   : > { %1438 = vmatprep.subr.bf16.mxu0 %v2330_v43 }
 0x631   : > { %1439 = vmatpush1.bf16.msra.mxu0 %v2217_v48 }
 0x632   : > { %1440 = vmatprep.subr.bf16.mxu0 %v2330_v43 }
 0x635   : > { %1441 = vmatpush1.bf16.msra.mxu0 %v2218_v49 }
 0x636   : > { %1442 = vmatprep.subr.bf16.mxu0 %v2330_v43 }
 0x639   : > { %1443 = vmatpush1.bf16.msra.mxu0 %v2219_v50 }
 0x63a   : > { %1444 = vmatprep.subr.bf16.mxu0 %v2330_v43 }
 0x63d   : > { %1445 = vmatpush1.bf16.msra.mxu0 %v2220_v51 }
 0x63e   : > { %1446 = vmatprep.subr.bf16.mxu0 %v2330_v43 }
 0x641   : > { %1447 = vmatpush1.bf16.msra.mxu0 %v2221_v52  ;;  %v2259_v52 = vld [vmem:[%s2947_s5 + $0xb4] ss:$8 sps:$4 sm:$0xff]  }
 0x642   : > { %1448 = vmatprep.subr.bf16.mxu0 %v2330_v43 }
 0x645   : > { %1449 = vmatpush1.bf16.msra.mxu0 %v2222_v53 }
 0x646   : > { %1450 = vmatprep.subr.bf16.mxu0 %v2330_v43  ;;  %v2223_v43 = vld [vmem:[%s2945_s3 + $0x238] sm:$0xff]  }
 0x649   : > { %1451 = vmatpush1.bf16.msra.mxu0 %v2223_v43 }
 0x6ef   : > { %v1110_v18 = vpop.f32.mrb[8].mxu0 }
 0x6f0   : > { %v1111_v19 = vadd.f32 %v1908_v62, %v1110_v18  ;;  %v1112_v20 = vpop.f32.mrb[9].mxu0  ;;  %v2224_v18 = vld [vmem:[%s2947_s5] ss:$8 sps:$4 sm:$0xff]  }
 0x6f1   : > { %v1113_v21 = vpop.f32.mrb[10].mxu0  ;;  %v2229_v20 = vld [vmem:[%s2947_s5 + $0x14] ss:$8 sps:$4 sm:$0xff]  }
 0x6f2   : > { %vm1117_vm1 = vcmp.ge.f32.partialorder %v1111_v19, 0.0  ;;  %v1119_v1 = vmul.f32 0.1, %v1111_v19  ;;  %v1114_v22 = vadd.f32 %v1908_v62, %v1113_v21  ;;  %v1115_v23 = vpop.f32.mrb[11].mxu0  ;;  %v2227_v21 = vld [vmem:[%s2947_s5 + $0x10] ss:$8 sps:$4 sm:$0xff]  }
 0x6f3   : > { %v2235_v23 = vld [vmem:[%s2947_s5 + $0x34] ss:$8 sps:$4 sm:$0xff]  }
 0x6f4   : > { %v1121_v24 = vsel %vm1117_vm1, %v1111_v19, %v1119_v1  ;;  %vm1118_vm2 = vcmp.ge.f32.partialorder %v1114_v22, 0.0  ;;  %v1120_v25 = vmul.f32 0.1, %v1114_v22  ;;  %v2226_v19 = vld [vmem:[%s2947_s5 + $0x4] ss:$8 sps:$4 sm:$0xff]  }
 0x6f5   : > { %v2733_v26 = vadd.f32 %v1121_v24, %v2611_v13  ;;  %1656 = vmatprep.subr.bf16.mxu1 %v2226_v19  ;;  %v2232_v1 = vld [vmem:[%s2947_s5 + $0x24] ss:$8 sps:$4 sm:$0xff]   ;;  %v2233_v24 = vld [vmem:[%s2947_s5 + $0x30] ss:$8 sps:$4 sm:$0xff]  }
 0x6f6   : > { %v1122_v27 = vsel %vm1118_vm2, %v1114_v22, %v1120_v25  ;;  %v2230_v22 = vld [vmem:[%s2947_s5 + $0x20] ss:$8 sps:$4 sm:$0xff]   ;;  %v2238_v25 = vld [vmem:[%s2947_s5 + $0x44] ss:$8 sps:$4 sm:$0xff]  }
 0x6f7   : > { %1125 = vst.msk [vmem:[#allocation2 + $0x2] sm:$0xff] %vm422_vm9, %v2733_v26  ;;  %v2738_v28 = vadd.f32 %v1122_v27, %v2616_v15  ;;  %v2236_v27 = vld [vmem:[%s2947_s5 + $0x40] ss:$8 sps:$4 sm:$0xff]  }
 0x6f9   : > { %1126 = vst.msk [vmem:[#allocation2 + $0xa] sm:$0xff] %vm422_vm9, %v2738_v28 }
 0x6fe   : > { %v1156_v30 = vld [vmem:[#allocation2 + $0x2] sm:$0xff] }
 0x6ff   : > { %v1154_v37 = vld [vmem:[#allocation2 + $0x1] sm:$0xff] }
 0x700   : > { %v1158_v31 = vld [vmem:[#allocation2 + $0x3] sm:$0xff]  ;;  %v1159_v32 = vld [vmem:[#allocation2 + $0xb] sm:$0xff] }
 0x701   : > { %v1157_v13 = vld [vmem:[#allocation2 + $0xa] sm:$0xff]  ;;  %v1171_v33 = vpack.c.bf16 %v1159_v32, %v1158_v31 }
 0x702   : > { %v2134_v34 = vpack.i.bf16 %v1157_v13, %v1156_v30  ;;  %v1155_v38 = vld [vmem:[#allocation2 + $0x9] sm:$0xff]  ;;  %v2247_v13 = vld [vmem:[%s2947_s5 + $0x74] ss:$8 sps:$4 sm:$0xff]  }
 0x703   : > { %1960 = vmatprep.mubr.msk.bf16.mxu1 %vm422_vm9, %v1171_v33  ;;  %v2239_v30 = vld [vmem:[%s2947_s5 + $0x50] ss:$8 sps:$4 sm:$0xff]   ;;  %v2244_v31 = vld [vmem:[%s2947_s5 + $0x64] ss:$8 sps:$4 sm:$0xff]   ;;  %v2242_v32 = vld [vmem:[%s2947_s5 + $0x60] ss:$8 sps:$4 sm:$0xff]  }
 0x704   : > { %2135 = vrot.lane.b32.xlu0 %v2134_v34, %s2331_s14  ;;  %v2245_v33 = vld [vmem:[%s2947_s5 + $0x70] ss:$8 sps:$4 sm:$0xff]   ;;  %v2250_v34 = vld [vmem:[%s2947_s5 + $0x84] ss:$8 sps:$4 sm:$0xff]  }
 0x776   : > { %v2136_v15 = vpop.permute.xlu0 %2135 }
 0x777   : > { %v2138_v35 = vunpack.i.h.bf16 %v2136_v15  ;;  %v2137_v36 = vunpack.i.l.bf16 %v2136_v15  ;;  %v2248_v15 = vld [vmem:[%s2947_s5 + $0x80] ss:$8 sps:$4 sm:$0xff]  }
 0x779   : > { %v1168_v39 = vsel %vm422_vm9, %v1154_v37, %v2137_v36  ;;  %v1169_v40 = vsel %vm422_vm9, %v1155_v38, %v2138_v35  ;;  %v2253_v35 = vld [vmem:[%s2947_s5 + $0x94] ss:$8 sps:$4 sm:$0xff]   ;;  %v2251_v36 = vld [vmem:[%s2947_s5 + $0x90] ss:$8 sps:$4 sm:$0xff]   ;;  %v2256_v37 = vld [vmem:[%s2947_s5 + $0xa4] ss:$8 sps:$4 sm:$0xff]  }
 0x77a   : > { %v1170_v41 = vpack.c.bf16 %v1169_v40, %v1168_v39  ;;  %v2254_v38 = vld [vmem:[%s2947_s5 + $0xa0] ss:$8 sps:$4 sm:$0xff]   ;;  %v1986_v39 = vld [vmem:[%s2946_s4 + $0x5] ss:$0 sm:$0xff] }
 0x77c   : > { %1286 = vmatmul.mubr.bf16.vlgmr.msra.gmra.mrb[8].mxu1 %v1170_v41 }
 0x77d   : > { %1657 = vmatpush1.bf16.msra.mxu1 %v2224_v18 }
 0x77e   : > { %1658 = vmatprep.subr.bf16.mxu1 %v2229_v20 }
 0x781   : > { %1659 = vmatpush1.bf16.msra.mxu1 %v2227_v21 }
 0x782   : > { %1660 = vmatprep.subr.bf16.mxu1 %v2232_v1 }
 0x785   : > { %1661 = vmatpush1.bf16.msra.mxu1 %v2230_v22 }
 0x786   : > { %1662 = vmatprep.subr.bf16.mxu1 %v2235_v23 }
 0x789   : > { %1663 = vmatpush1.bf16.msra.mxu1 %v2233_v24 }
 0x78a   : > { %1664 = vmatprep.subr.bf16.mxu1 %v2238_v25 }
 0x78d   : > { %1665 = vmatpush1.bf16.msra.mxu1 %v2236_v27 }
 0x78e   : > { %1666 = vmatprep.subr.bf16.mxu1 %v2241_v29 }
 0x791   : > { %1667 = vmatpush1.bf16.msra.mxu1 %v2239_v30 }
 0x792   : > { %1668 = vmatprep.subr.bf16.mxu1 %v2244_v31 }
 0x795   : > { %1669 = vmatpush1.bf16.msra.mxu1 %v2242_v32 }
 0x796   : > { %1670 = vmatprep.subr.bf16.mxu1 %v2247_v13 }
 0x799   : > { %1671 = vmatpush1.bf16.msra.mxu1 %v2245_v33 }
 0x79a   : > { %1672 = vmatprep.subr.bf16.mxu1 %v2250_v34 }
 0x79d   : > { %1673 = vmatpush1.bf16.msra.mxu1 %v2248_v15 }
 0x79e   : > { %1674 = vmatprep.subr.bf16.mxu1 %v2253_v35 }
 0x7a1   : > { %1675 = vmatpush1.bf16.msra.mxu1 %v2251_v36 }
 0x7a2   : > { %1676 = vmatprep.subr.bf16.mxu1 %v2256_v37 }
 0x7a5   : > { %1677 = vmatpush1.bf16.msra.mxu1 %v2254_v38 }
 0x7a6   : > { %1678 = vmatprep.subr.bf16.mxu1 %v2259_v52 }
 0x84f   : > { %v1287_v55 = vpop.f32.mrb[8].mxu1 }
 0x850   : > { %v1288_v56 = vadd.f32 %v1947_v54, %v1287_v55  ;;  %v1289_v57 = vpop.f32.mrb[9].mxu1 }
 0x851   : > { %v1290_v58 = vpop.f32.mrb[10].mxu1 }
 0x852   : > { %vm1294_vm3 = vcmp.ge.f32.partialorder %v1288_v56, 0.0  ;;  %v1296_v59 = vmul.f32 0.1, %v1288_v56  ;;  %v1291_v60 = vadd.f32 %v1947_v54, %v1290_v58  ;;  %v1292_v61 = vpop.f32.mrb[11].mxu1  ;;  %v2257_v54 = vld [vmem:[%s2947_s5 + $0xb0] ss:$8 sps:$4 sm:$0xff]  }
 0x853   : > { %1679 = vmatpush1.bf16.msra.mxu1 %v2257_v54 }
 0x854   : > { %v1298_v63 = vsel %vm1294_vm3, %v1288_v56, %v1296_v59  ;;  %vm1295_vm4 = vcmp.ge.f32.partialorder %v1291_v60, 0.0  ;;  %v1297_v0 = vmul.f32 0.1, %v1291_v60 }
 0x855   : > { %1300 = vst.msk [vmem:[#allocation2 + $0x2] sm:$0xff] %vm422_vm9, %v1298_v63 }
 0x856   : > { %v1299_v2 = vsel %vm1295_vm4, %v1291_v60, %v1297_v0 }
 0x857   : > { %1301 = vst.msk [vmem:[#allocation2 + $0xa] sm:$0xff] %vm422_vm9, %v1299_v2 }
 0x85c   : > { %v1331_v3 = vld [vmem:[#allocation2 + $0x2] sm:$0xff] }
 0x85d   : > { %v1329_v12 = vld [vmem:[#allocation2 + $0x1] sm:$0xff] }
 0x85e   : > { %v1333_v4 = vld [vmem:[#allocation2 + $0x3] sm:$0xff]  ;;  %v1334_v5 = vld [vmem:[#allocation2 + $0xb] sm:$0xff] }
 0x85f   : > { %v1332_v6 = vld [vmem:[#allocation2 + $0xa] sm:$0xff]  ;;  %v1346_v7 = vpack.c.bf16 %v1334_v5, %v1333_v4  ;;  %v1523_v4 = vlaneseq }
 0x860   : > { %v2139_v8 = vpack.i.bf16 %v1332_v6, %v1331_v3  ;;  %v1330_v14 = vld [vmem:[#allocation2 + $0x9] sm:$0xff] }
 0x861   : > { %1999 = vmatprep.mubr.msk.bf16.mxu0 %vm422_vm9, %v1346_v7  ;;  %v1524_v5 = vshrl.u32 %v1523_v4, 7  ;;  %v1503_v7 = vld [vmem:[%s2948_s6] sm:$0x3] }
 0x862   : > { %2140 = vrot.lane.b32.xlu1 %v2139_v8, %s2331_s14 }
 0x863   : > { %v1525_v6 = vsub.s32 0, %v1524_v5  ;;  %v1529_v8 = vsub.s32 1, %v1524_v5 }
 0x8d4   : > { %v2141_v9 = vpop.permute.xlu1 %2140 }
 0x8d5   : > { %v2143_v10 = vunpack.i.h.bf16 %v2141_v9  ;;  %v2142_v11 = vunpack.i.l.bf16 %v2141_v9  ;;  %v1526_v9 = vrot.slane %v1503_v7, %v1525_v6 }
 0x8d7   : > { %v1343_v16 = vsel %vm422_vm9, %v1329_v12, %v2142_v11  ;;  %v1344_v17 = vsel %vm422_vm9, %v1330_v14, %v2143_v10  ;;  %v1530_v10 = vrot.slane %v1503_v7, %v1529_v8 }
 0x8d8   : > { %v1345_v62 = vpack.c.bf16 %v1344_v17, %v1343_v16 }
 0x8da   : > { %1461 = vmatmul.mubr.bf16.vlgmr.msra.gmra.mrb[12].mxu0 %v1345_v62 }
 0x9ad   : > { %v1462_v40 = vpop.f32.mrb[12].mxu0 }
 0x9ae   : > { %v1463_v41 = vadd.f32 %v1986_v39, %v1462_v40  ;;  %v1464_v42 = vpop.f32.mrb[13].mxu0 }
 0x9af   : > { %v1465_v44 = vpop.f32.mrb[14].mxu0 }
 0x9b0   : > { %vm1469_vm5 = vcmp.ge.f32.partialorder %v1463_v41, 0.0  ;;  %v1471_v45 = vmul.f32 0.1, %v1463_v41  ;;  %v1466_v46 = vadd.f32 %v1986_v39, %v1465_v44  ;;  %v1467_v47 = vpop.f32.mrb[15].mxu0 }
 0x9b2   : > { %v1473_v48 = vsel %vm1469_vm5, %v1463_v41, %v1471_v45  ;;  %vm1470_vm6 = vcmp.ge.f32.partialorder %v1466_v46, 0.0  ;;  %v1472_v49 = vmul.f32 0.1, %v1466_v46 }
 0x9b3   : > { %v1475_v50 = vadd.f32 %v1473_v48, %v2733_v26 }
 0x9b4   : > { %v1474_v51 = vsel %vm1470_vm6, %v1466_v46, %v1472_v49 }
 0x9b5   : > { %1477 = vst.msk [vmem:[#allocation2 + $0x2] sm:$0xff] %vm422_vm9, %v1475_v50  ;;  %v1476_v53 = vadd.f32 %v1474_v51, %v2738_v28 }
 0x9b7   : > { %1478 = vst.msk [vmem:[#allocation2 + $0xa] sm:$0xff] %vm422_vm9, %v1476_v53 }
 0x9bc   : > { %v1506_v55 = vld [vmem:[#allocation2 + $0x2] sm:$0xff] }
 0x9bd   : > { %v1504_v63 = vld [vmem:[#allocation2 + $0x1] sm:$0xff] }
 0x9be   : > { %v1508_v56 = vld [vmem:[#allocation2 + $0x3] sm:$0xff]  ;;  %v1509_v26 = vld [vmem:[#allocation2 + $0xb] sm:$0xff] }
 0x9bf   : > { %v1507_v57 = vld [vmem:[#allocation2 + $0xa] sm:$0xff]  ;;  %v1521_v58 = vpack.c.bf16 %v1509_v26, %v1508_v56 }
 0x9c0   : > { %v2144_v59 = vpack.i.bf16 %v1507_v57, %v1506_v55  ;;  %v1505_v0 = vld [vmem:[#allocation2 + $0x9] sm:$0xff] }
 0x9c1   : > { %2024 = vmatprep.mubr.msk.bf16.mxu1 %vm422_vm9, %v1521_v58 }
 0x9c2   : > { %2145 = vrot.lane.b32.xlu0 %v2144_v59, %s2331_s14  ;;  %s1783_s14 = sshll.u32 %s269_s15, 5 }
 0x9c3   : > { %s271_s18 = scalar_lea.vmem [#allocation3], %s1783_s14 }
 0x9c4   : > { %s1717_s19 = sshll.u32 %s271_s18, 4  ;;  %s2893_s19 = int_to_ptr.vmem [resolvable:$true] %s1717_s19 }
 0x9c5   : > { %s2260_s29 = scalar_lea.vmem %s2893_s19, 512  ;;  %p2267_p0 = scmp.lt.s32.totalorder %s2893_s19, %s2265_s13 }
 0x9c6   : > { %p2261_p11 = scmp.ne.s32.totalorder %s2893_s19, %s2260_s29  ;;  %p2268_p1 = scmp.lt.s32.totalorder %s2266_s16, %s2260_s29 }
 0x9c8   : > { %p2262_p12 = pnand %p2261_p11, %p2412_p5  ;;  %p2269_p2 = por %p2268_p1, %p2267_p0 }
 0x9ca   : > { %p2263_p13 = pneg %p2262_p12 }
 0x9cc   : > { %p2270_p3 = pnand %p2269_p2, %p2263_p13 }
 0xa34   : > { %v2146_v28 = vpop.permute.xlu0 %2145 }
 0xa35   : > { %v2148_v60 = vunpack.i.h.bf16 %v2146_v28  ;;  %v2147_v61 = vunpack.i.l.bf16 %v2146_v28 }
 0xa37   : > { %v1518_v43 = vsel %vm422_vm9, %v1504_v63, %v2147_v61  ;;  %v1519_v2 = vsel %vm422_vm9, %v1505_v0, %v2148_v60 }
 0xa38   : > { %v1520_v3 = vpack.c.bf16 %v1519_v2, %v1518_v43 }
 0xa3a   : > { %1689 = vmatmul.mubr.bf16.vlgmr.msra.gmra.mrb[12].mxu1 %v1520_v3 }
 0xb0d   : > { %v1690_v11 = vpop.f32.mrb[12].mxu1 }
 0xb0e   : > { %v1691_v12 = vadd.f32 %v1690_v11, %v1526_v9  ;;  %v1692_v14 = vpop.f32.mrb[13].mxu1 }
 0xb0f   : > { %v1693_v16 = vadd.f32 %v1692_v14, %v1530_v10  ;;  %v1694_v17 = vpop.f32.mrb[14].mxu1 }
 0xb10   : > { %1699 = vst [vmem:[%s271_s18] sm:$0xff] %v1691_v12  ;;  %v1695_v62 = vadd.f32 %v1694_v17, %v1526_v9  ;;  %v1696_v18 = vpop.f32.mrb[15].mxu1 }
 0xb11   : > { %1700 = vst [vmem:[%s271_s18 + $0x8] sm:$0xff] %v1693_v16  ;;  %v1697_v19 = vadd.f32 %v1696_v18, %v1530_v10 }
 0xb12   : > { %1701 = vst [vmem:[%s271_s18 + $0x10] sm:$0xff] %v1695_v62 }
 0xb13   : > { %1702 = vst [vmem:[%s271_s18 + $0x18] sm:$0xff] %v1697_v19 }
 0xb14   : > { %2273 = shalt.err (!%p2270_p3)
}
 0xb15   : > { %s2274_s15 = scalar_lea.hbm %s2898_s23, 512  ;;  %s2278_s18 = scalar_lea.hbm %s2949_s7, 1024 }
 0xb16   : > { %p2275_p4 = scmp.ne.s32.totalorder %s2898_s23, %s2274_s15  ;;  %p2279_p9 = scmp.lt.u32.totalorder %s2898_s23, %s2949_s7 }
 0xb17   : > { %p2280_p10 = scmp.lt.u32.totalorder %s2278_s18, %s2274_s15  ;;  %p2282_p12 = scmp.lt.u32.totalorder %s2274_s15, %s2898_s23 }
 0xb18   : > { %p2276_p7 = pnand %p2275_p4, %p2412_p5 }
 0xb19   : > { %p2281_p11 = por %p2280_p10, %p2279_p9 }
 0xb1a   : > { %p2277_p8 = pneg %p2276_p7 }
 0xb1b   : > { %p2283_p13 = por %p2282_p12, %p2281_p11 }
 0xb1d   : > { %p2284_p0 = pnand %p2283_p13, %p2277_p8 }
 0xb1f   : > { %2287 = shalt.err (!%p2284_p0)
}
 0xb20   : > { %s2333_s22 = smov 256  }
 0xb21   : > { %2046 = dma.vmem_to_hbm [thread:$0]  (%p2412_p5), %s2893_s19, 512, %s2898_s23, %s2900_s28, %s2333_s22, %s2333_s22, %s2328_s9  }
 0xb22 PF: > { %p2052_p1 = scmp.ge.s32.totalorder %s2322_s27, 2  ;;  %s1732_s29 = sand.u32 1, %s2310_s24  }
 0xb23   : > { %s1733_s8 = scalar_lea.sflag [#allocation4], %s1732_s29 }
 0xb24   : > { %p2049_p2 = pnand %p2052_p1, %p2416_p6 }
 0xb26   : > { %2305 = dma.done.wait (!%p2049_p2), %s1733_s8, 512  }
 0xb27   : > { %2307 = vsyncadd (!%p2049_p2), %s1733_s8, 4294966784  ;;  %p17_p3 = scmp.ge.s32.totalorder %s2399_s30, 4   ;;  %s2952_s24 = smov %s2314_s25 }
 0xb28   : > { %s2953_s25 = smov %s2318_s26  ;;  %s2954_s26 = smov %s2410_s10 }
 0xb29   : > { %s2955_s27 = smov %s2399_s30  ;;  %19 = sbr.rel (!%p17_p3) target bundleno = 3 (0x3), region = 93 }
 0xb30   :  { %1738 = vsyncpa [#allocation4], 1 }
 0xb31   :  { %1740 = vsyncpa [#allocation4 + $0x1], 1 }

</bundles_post_ra>
